<compile_context>
chip_gen: v6e
topology: v6e:2x2x1
jax: 0.10.0
libtpu: 0.0.40
codegen_flags: <defaults>
</compile_context>

<pallas_src>
import jax
import jax.numpy as jnp
from jax import lax
from jax.experimental import pallas as pl
from jax.experimental.pallas import tpu as pltpu


def basic_block_kernel(x_ref, b1_ref, t1_ref, b2_ref, t2_ref, o_ref, slab_ref):
    """One grid step = `NB` batch images stacked into the matmul M dimension.

    x_ref    : (NB, H, W*C)      unpadded lane-dense input rows
    b1_ref   : (3*W*C, W*C)      conv1 banded weights, ky folded into K,
                                 BN1 scale pre-folded into the output columns
    t1_ref   : (1, W*C)          BN1 bias (per-channel, tiled over W), f32
    b2_ref/t2_ref                same for conv2 / BN2
    o_ref    : (NB, H, W*C)      block output
    slab_ref : (NB*(H+2), W*C)   VMEM scratch: H-padded activations
                                 (zero separator rows between images)
    """
    NB, H, WC = o_ref.shape
    stride = H + 2
    m_out = NB * stride - 2          # conv-result rows 0 .. m_out-1

    def conv3x3(w_ref):
        # ky folded into the contraction: one (m_out, 3*WC) x (3*WC, WC) MXU
        # matmul with f32 accumulation (K = 3*WC fills the 256-deep MXU on
        # v6e/v7x; a single push/pop per conv instead of three).
        q = jnp.concatenate(
            [slab_ref[0:m_out, :],
             slab_ref[1:m_out + 1, :],
             slab_ref[2:m_out + 2, :]], axis=-1)
        return jnp.dot(q, w_ref[...], preferred_element_type=jnp.float32)

    # Zero only the per-image border rows (interiors are fully overwritten
    # below).  Re-done every grid step so this stays correct when the
    # "parallel" batch axis is sharded across megacore TensorCores.
    zrow = jnp.zeros((1, WC), slab_ref.dtype)
    for b in range(NB):
        base = b * stride
        slab_ref[base:base + 1, :] = zrow
        slab_ref[base + H + 1:base + H + 2, :] = zrow

    # ---- conv1 (BN1 scale folded into weights) -> +bias -> relu ----
    for b in range(NB):
        slab_ref[b * stride + 1:b * stride + 1 + H, :] = (
            x_ref[b].astype(slab_ref.dtype))
    out1 = jnp.maximum(conv3x3(b1_ref) + t1_ref[...], 0.0)

    # ---- conv2 (BN2 scale folded) -> +bias -> +residual -> relu ----
    for b in range(NB):
        slab_ref[b * stride + 1:b * stride + 1 + H, :] = (
            out1[b * stride:b * stride + H].astype(slab_ref.dtype))
    out2 = conv3x3(b2_ref) + t2_ref[...]           # f32 elementwise tail
    for b in range(NB):
        res = out2[b * stride:b * stride + H] + x_ref[b].astype(jnp.float32)
        o_ref[b, :, :] = jnp.maximum(res, 0.0).astype(o_ref.dtype)


def _fold_bn(bn, eps):
    gamma, beta, mean, var = bn
    scale = gamma / jnp.sqrt(var + eps)
    bias = beta - mean * scale
    return scale, bias


def _banded_conv_weights(w_oihw, width, out_scale, dtype):
    """OIHW 3x3 conv weights -> (3*W*Cin, W*Cout) block-banded matrix.

    B[ky*W*Cin + wi*Cin + ci, wo*Cout + co] = w[co, ci, ky, wi - wo + 1] * s[co]
    (zero outside the |wi - wo| <= 1 band).  The kx taps, the W-boundary zero
    padding and the per-output-channel BN scale `out_scale` are all folded into
    the contraction; the ky taps are stacked along K so one matmul of an
    (M, 3*W*Cin) row-shifted slab yields the full conv output.

    Note: materializes a (3, W, W, Cin, Cout) intermediate at trace time; for
    large W tile it (or the W dimension of the band) in chunks.
    """
    cout, cin, _, _ = w_oihw.shape
    w = w_oihw.astype(jnp.float32) * out_scale[:, None, None, None]   # fold BN
    hwio = jnp.transpose(w, (2, 3, 1, 0))                 # (3, 3, Cin, Cout)
    wi = jnp.arange(width)[:, None]
    wo = jnp.arange(width)[None, :]
    kx = wi - wo + 1                                       # (W, W)
    valid = (kx >= 0) & (kx <= 2)
    band = hwio[:, jnp.clip(kx, 0, 2)]                     # (3, W, W, Cin, Cout)
    band = band * valid[None, :, :, None, None].astype(band.dtype)
    band = jnp.transpose(band, (0, 1, 3, 2, 4))            # (3, W, Cin, W, Cout)
    band = band.reshape(3, width * cin, width * cout)
    return band.reshape(3 * width * cin, width * cout).astype(dtype)


def _pick_block_n(n_batch, height):
    """Largest divisor of N with block_n*(H+2) <= 512: fills the MXU M dim
    without blowing up VMEM.  TODO(synk): on v7x prefer leaving >=2 grid steps
    so both TensorCores are used."""
    for bn in range(n_batch, 0, -1):
        if n_batch % bn == 0 and bn * (height + 2) <= 512:
            return bn
    return 1


def _pallas_forward(x_rows, b1, t1, b2, t2, *, block_n, compute_dtype,
                    single_buffer, vmem_limit_bytes):
    N, H, WC = x_rows.shape

    def const_spec(shape):
        if single_buffer:
            # Grid-invariant operand: never re-DMAs, so single-buffer it.
            return pl.BlockSpec(shape, lambda n: (0, 0),
                                pipeline_mode=pl.Buffered(1))
        return pl.BlockSpec(shape, lambda n: (0, 0))

    cp = dict(dimension_semantics=("parallel",))
    if vmem_limit_bytes is not None:
        cp["vmem_limit_bytes"] = vmem_limit_bytes

    call = pl.pallas_call(
        basic_block_kernel,
        out_shape=jax.ShapeDtypeStruct((N, H, WC), x_rows.dtype),
        grid_spec=pltpu.PrefetchScalarGridSpec(
            num_scalar_prefetch=0,
            grid=(N // block_n,),
            in_specs=[
                pl.BlockSpec((block_n, H, WC), lambda n: (n, 0, 0)),  # x
                const_spec((3 * WC, WC)),                             # banded w1
                const_spec((1, WC)),                                  # bn1 bias
                const_spec((3 * WC, WC)),                             # banded w2
                const_spec((1, WC)),                                  # bn2 bias
            ],
            out_specs=pl.BlockSpec((block_n, H, WC), lambda n: (n, 0, 0)),
            scratch_shapes=[
                pltpu.VMEM((block_n * (H + 2), WC), compute_dtype),   # padded slab
            ],
        ),
        compiler_params=pltpu.CompilerParams(**cp),
    )
    return call(x_rows, b1, t1, b2, t2)


def basic_block_forward_nhwc(x_nhwc, w1, bn1, w2, bn2, *, eps=1e-5,
                             compute_dtype=jnp.bfloat16, block_n=None,
                             vmem_limit_bytes=None):
    """Fused BasicBlock forward on NHWC activations (preferred, hot-path layout)."""
    N, H, W, C = x_nhwc.shape
    WC = W * C
    assert WC % 128 == 0, "lane-dense layout requires W*C to be a multiple of 128"
    assert w1.shape == (C, C, 3, 3) and w2.shape == (C, C, 3, 3), (
        "no-downsample BasicBlock requires inplanes == planes (3x3 kernels)")

    if block_n is None:
        block_n = _pick_block_n(N, H)
    assert N % block_n == 0

    # Fold eval-mode BN: scale goes into the conv weight columns (before the
    # compute-dtype cast), only the bias survives as a kernel operand.
    s1, t1 = _fold_bn(bn1, eps)
    s2, t2 = _fold_bn(bn2, eps)
    b1 = _banded_conv_weights(w1, W, s1, compute_dtype)    # (3*WC, WC)
    b2 = _banded_conv_weights(w2, W, s2, compute_dtype)
    t1 = jnp.tile(t1, W).reshape(1, WC).astype(jnp.float32)
    t2 = jnp.tile(t2, W).reshape(1, WC).astype(jnp.float32)

    # (N, H, W, C) -> (N, H, W*C): free row-major collapse, lane-dense last dim.
    x_rows = x_nhwc.reshape(N, H, WC)

    kwargs = dict(block_n=block_n, compute_dtype=compute_dtype,
                  vmem_limit_bytes=vmem_limit_bytes)
    try:
        out_rows = _pallas_forward(x_rows, b1, t1, b2, t2,
                                   single_buffer=True, **kwargs)
    except Exception:
        # pipeline_mode=pl.Buffered(1) unsupported on this JAX/TPU build:
        # fall back to default double-buffering (correctness unaffected).
        out_rows = _pallas_forward(x_rows, b1, t1, b2, t2,
                                   single_buffer=False, **kwargs)

    return out_rows.reshape(N, H, W, C)


def basic_block_forward(x_nchw, w1, bn1, w2, bn2, **kwargs):
    """NCHW (PyTorch-layout) compatibility wrapper.

    # TODO(synk): keep activations NHWC end-to-end in a full network; these
    # two transposes are a per-block HBM round trip the NHWC entry point avoids.
    """
    x_nhwc = jnp.transpose(x_nchw, (0, 2, 3, 1))
    y = basic_block_forward_nhwc(x_nhwc, w1, bn1, w2, bn2, **kwargs)
    return jnp.transpose(y, (0, 3, 1, 2))


def reference_forward_nhwc(x, w1, bn1, w2, bn2, eps=1e-5):
    """Plain-JAX reference (NHWC convs, eval-mode BN)."""
    def conv(a, w_oihw):
        w_hwio = jnp.transpose(w_oihw, (2, 3, 1, 0))
        return lax.conv_general_dilated(
            a, w_hwio, window_strides=(1, 1), padding=((1, 1), (1, 1)),
            dimension_numbers=("NHWC", "HWIO", "NHWC"))

    def bn(a, p):
        g, b, m, v = (t.reshape(1, 1, 1, -1) for t in p)
        return (a - m) / jnp.sqrt(v + eps) * g + b

    out = jnp.maximum(bn(conv(x, w1), bn1), 0.0)
    out = bn(conv(out, w2), bn2)
    return jnp.maximum(out + x, 0.0)


if __name__ == "__main__":
    key = jax.random.PRNGKey(0)
    N, H, W, C = 2, 16, 16, 8       # inplanes = planes = 8, stride = 1, W*C = 128
    ks = jax.random.split(key, 9)

    # NHWC activations (primary layout, no transposes on the hot path)
    x = jax.random.normal(ks[0], (N, H, W, C), jnp.float32)

    # conv weights, OIHW as in PyTorch
    w1 = jax.random.normal(ks[1], (C, C, 3, 3), jnp.float32) * 0.1
    w2 = jax.random.normal(ks[2], (C, C, 3, 3), jnp.float32) * 0.1

    # BN params: (gamma, beta, running_mean, running_var)
    bn1 = (1.0 + 0.1 * jax.random.normal(ks[3], (C,), jnp.float32),
           0.1 * jax.random.normal(ks[4], (C,), jnp.float32),
           0.1 * jax.random.normal(ks[5], (C,), jnp.float32),
           jnp.abs(jax.random.normal(ks[6], (C,), jnp.float32)) + 0.5)
    bn2 = (1.0 + 0.1 * jax.random.normal(ks[7], (C,), jnp.float32),
           0.1 * jax.random.normal(ks[8], (C,), jnp.float32),
           jnp.zeros((C,), jnp.float32),
           jnp.ones((C,), jnp.float32))

    ref = reference_forward_nhwc(x, w1, bn1, w2, bn2)

    # f32 matmul path: tight check against the reference.
    out_f32 = jax.block_until_ready(
        basic_block_forward_nhwc(x, w1, bn1, w2, bn2, compute_dtype=jnp.float32))
    assert out_f32.shape == (N, H, W, C)
    assert jnp.allclose(out_f32, ref, atol=1e-3, rtol=1e-3)

    # bf16 matmul path (default, MXU-native on v6e/v7x): looser check.
    out_bf16 = jax.block_until_ready(basic_block_forward_nhwc(x, w1, bn1, w2, bn2))
    assert out_bf16.shape == (N, H, W, C)
    assert jnp.allclose(out_bf16, ref, atol=1e-1, rtol=1e-1)

    # NCHW (PyTorch-layout) compatibility wrapper — off the hot path.
    x_nchw = jnp.transpose(x, (0, 3, 1, 2))
    out_nchw = jax.block_until_ready(
        basic_block_forward(x_nchw, w1, bn1, w2, bn2, compute_dtype=jnp.float32))
    assert out_nchw.shape == (N, C, H, W)
    assert jnp.allclose(out_nchw, jnp.transpose(ref, (0, 3, 1, 2)),
                        atol=1e-3, rtol=1e-3)

    print("KERNEL_OK")
</pallas_src>

<mosaic_0001>
module attributes {stable_mosaic.version = 11 : i64} {
  func.func @basic_block_kernel(%arg0: i32, %arg1: memref<2x16x128xf32, #tpu.memory_space<vmem>>, %arg2: memref<384x128xf32, #tpu.memory_space<vmem>>, %arg3: memref<1x128xf32, #tpu.memory_space<vmem>>, %arg4: memref<384x128xf32, #tpu.memory_space<vmem>>, %arg5: memref<1x128xf32, #tpu.memory_space<vmem>>, %arg6: memref<2x16x128xf32, #tpu.memory_space<vmem>>, %arg7: memref<36x128xf32, #tpu.memory_space<vmem>>) attributes {dimension_semantics = [#tpu.dimension_semantics<parallel>], iteration_bounds = array<i64: 1>, scalar_prefetch = 0 : i64, scratch_operands = 1 : i64, tpu.core_type = #tpu.core_type<tc>, window_params = [{transform_indices = @transform_0, window_bounds = array<i64: 2, 16, 128>}, {pipeline_mode = #tpu.pipeline_mode<synchronous>, transform_indices = @transform_1, window_bounds = array<i64: 384, 128>}, {pipeline_mode = #tpu.pipeline_mode<synchronous>, transform_indices = @transform_2, window_bounds = array<i64: 1, 128>}, {pipeline_mode = #tpu.pipeline_mode<synchronous>, transform_indices = @transform_3, window_bounds = array<i64: 384, 128>}, {pipeline_mode = #tpu.pipeline_mode<synchronous>, transform_indices = @transform_4, window_bounds = array<i64: 1, 128>}, {transform_indices = @transform_5, window_bounds = array<i64: 2, 16, 128>}]} {
    %cst = arith.constant 0.000000e+00 : f32
    %0 = vector.broadcast %cst : f32 to vector<1x128xf32>
    %c0 = arith.constant 0 : index
    %c0_0 = arith.constant 0 : index
    %1 = vector.load %arg7[%c0, %c0_0] : memref<36x128xf32, #tpu.memory_space<vmem>>, vector<1x128xf32>
    tpu.vector_store %arg7[%c0, %c0_0], %0 {strides = array<i32>} : memref<36x128xf32, #tpu.memory_space<vmem>>, vector<1x128xf32>,
    %c17 = arith.constant 17 : index
    %c0_1 = arith.constant 0 : index
    %2 = vector.load %arg7[%c17, %c0_1] : memref<36x128xf32, #tpu.memory_space<vmem>>, vector<1x128xf32>
    tpu.vector_store %arg7[%c17, %c0_1], %0 {strides = array<i32>} : memref<36x128xf32, #tpu.memory_space<vmem>>, vector<1x128xf32>,
    %c18 = arith.constant 18 : index
    %c0_2 = arith.constant 0 : index
    %3 = vector.load %arg7[%c18, %c0_2] : memref<36x128xf32, #tpu.memory_space<vmem>>, vector<1x128xf32>
    tpu.vector_store %arg7[%c18, %c0_2], %0 {strides = array<i32>} : memref<36x128xf32, #tpu.memory_space<vmem>>, vector<1x128xf32>,
    %c35 = arith.constant 35 : index
    %c0_3 = arith.constant 0 : index
    %4 = vector.load %arg7[%c35, %c0_3] : memref<36x128xf32, #tpu.memory_space<vmem>>, vector<1x128xf32>
    tpu.vector_store %arg7[%c35, %c0_3], %0 {strides = array<i32>} : memref<36x128xf32, #tpu.memory_space<vmem>>, vector<1x128xf32>,
    %c0_4 = arith.constant 0 : index
    %c0_5 = arith.constant 0 : index
    %c0_6 = arith.constant 0 : index
    %5 = vector.load %arg1[%c0_4, %c0_5, %c0_6] : memref<2x16x128xf32, #tpu.memory_space<vmem>>, vector<1x16x128xf32>
    %6 = vector.shape_cast %5 : vector<1x16x128xf32> to vector<16x128xf32>
    %c1 = arith.constant 1 : index
    %c0_7 = arith.constant 0 : index
    %7 = vector.load %arg7[%c1, %c0_7] : memref<36x128xf32, #tpu.memory_space<vmem>>, vector<16x128xf32>
    tpu.vector_store %arg7[%c1, %c0_7], %6 {strides = array<i32>} : memref<36x128xf32, #tpu.memory_space<vmem>>, vector<16x128xf32>,
    %c1_8 = arith.constant 1 : index
    %c0_9 = arith.constant 0 : index
    %c0_10 = arith.constant 0 : index
    %8 = vector.load %arg1[%c1_8, %c0_9, %c0_10] : memref<2x16x128xf32, #tpu.memory_space<vmem>>, vector<1x16x128xf32>
    %9 = vector.shape_cast %8 : vector<1x16x128xf32> to vector<16x128xf32>
    %c19 = arith.constant 19 : index
    %c0_11 = arith.constant 0 : index
    %10 = vector.load %arg7[%c19, %c0_11] : memref<36x128xf32, #tpu.memory_space<vmem>>, vector<16x128xf32>
    tpu.vector_store %arg7[%c19, %c0_11], %9 {strides = array<i32>} : memref<36x128xf32, #tpu.memory_space<vmem>>, vector<16x128xf32>,
    %c0_12 = arith.constant 0 : index
    %c0_13 = arith.constant 0 : index
    %11 = vector.load %arg7[%c0_12, %c0_13] : memref<36x128xf32, #tpu.memory_space<vmem>>, vector<34x128xf32>
    %c1_14 = arith.constant 1 : index
    %c0_15 = arith.constant 0 : index
    %12 = vector.load %arg7[%c1_14, %c0_15] : memref<36x128xf32, #tpu.memory_space<vmem>>, vector<34x128xf32>
    %c2 = arith.constant 2 : index
    %c0_16 = arith.constant 0 : index
    %13 = vector.load %arg7[%c2, %c0_16] : memref<36x128xf32, #tpu.memory_space<vmem>>, vector<34x128xf32>
    %14 = tpu.concatenate %11, %12, %13 in 1 : vector<34x128xf32>, vector<34x128xf32>, vector<34x128xf32> -> vector<34x384xf32>
    %c0_17 = arith.constant 0 : index
    %c0_18 = arith.constant 0 : index
    %15 = vector.load %arg2[%c0_17, %c0_18] : memref<384x128xf32, #tpu.memory_space<vmem>>, vector<384x128xf32>
    %cst_19 = arith.constant dense<0.000000e+00> : vector<34x128xf32>
    %16 = tpu.matmul %14, %15, %cst_19 {dimension_numbers = #tpu.dot_dimension_numbers<[1], [0], [0], [1], [0, 0, 1, 1], [], []>} : vector<34x384xf32>, vector<384x128xf32>, vector<34x128xf32> -> vector<34x128xf32>
    %c0_20 = arith.constant 0 : index
    %c0_21 = arith.constant 0 : index
    %17 = vector.load %arg3[%c0_20, %c0_21] : memref<1x128xf32, #tpu.memory_space<vmem>>, vector<1x128xf32>
    %18 = vector.broadcast %17 : vector<1x128xf32> to vector<34x128xf32>
    %19 = arith.addf %16, %18 : vector<34x128xf32>
    %cst_22 = arith.constant 0.000000e+00 : f32
    %20 = vector.broadcast %cst_22 : f32 to vector<34x128xf32>
    %21 = arith.maximumf %19, %20 : vector<34x128xf32>
    %22 = vector.extract_strided_slice %21 {offsets = [0, 0], sizes = [16, 128], strides = [1, 1]} : vector<34x128xf32> to vector<16x128xf32>
    %c1_23 = arith.constant 1 : index
    %c0_24 = arith.constant 0 : index
    %23 = vector.load %arg7[%c1_23, %c0_24] : memref<36x128xf32, #tpu.memory_space<vmem>>, vector<16x128xf32>
    tpu.vector_store %arg7[%c1_23, %c0_24], %22 {strides = array<i32>} : memref<36x128xf32, #tpu.memory_space<vmem>>, vector<16x128xf32>,
    %24 = vector.extract_strided_slice %21 {offsets = [18, 0], sizes = [16, 128], strides = [1, 1]} : vector<34x128xf32> to vector<16x128xf32>
    %c19_25 = arith.constant 19 : index
    %c0_26 = arith.constant 0 : index
    %25 = vector.load %arg7[%c19_25, %c0_26] : memref<36x128xf32, #tpu.memory_space<vmem>>, vector<16x128xf32>
    tpu.vector_store %arg7[%c19_25, %c0_26], %24 {strides = array<i32>} : memref<36x128xf32, #tpu.memory_space<vmem>>, vector<16x128xf32>,
    %c0_27 = arith.constant 0 : index
    %c0_28 = arith.constant 0 : index
    %26 = vector.load %arg7[%c0_27, %c0_28] : memref<36x128xf32, #tpu.memory_space<vmem>>, vector<34x128xf32>
    %c1_29 = arith.constant 1 : index
    %c0_30 = arith.constant 0 : index
    %27 = vector.load %arg7[%c1_29, %c0_30] : memref<36x128xf32, #tpu.memory_space<vmem>>, vector<34x128xf32>
    %c2_31 = arith.constant 2 : index
    %c0_32 = arith.constant 0 : index
    %28 = vector.load %arg7[%c2_31, %c0_32] : memref<36x128xf32, #tpu.memory_space<vmem>>, vector<34x128xf32>
    %29 = tpu.concatenate %26, %27, %28 in 1 : vector<34x128xf32>, vector<34x128xf32>, vector<34x128xf32> -> vector<34x384xf32>
    %c0_33 = arith.constant 0 : index
    %c0_34 = arith.constant 0 : index
    %30 = vector.load %arg4[%c0_33, %c0_34] : memref<384x128xf32, #tpu.memory_space<vmem>>, vector<384x128xf32>
    %cst_35 = arith.constant dense<0.000000e+00> : vector<34x128xf32>
    %31 = tpu.matmul %29, %30, %cst_35 {dimension_numbers = #tpu.dot_dimension_numbers<[1], [0], [0], [1], [0, 0, 1, 1], [], []>} : vector<34x384xf32>, vector<384x128xf32>, vector<34x128xf32> -> vector<34x128xf32>
    %c0_36 = arith.constant 0 : index
    %c0_37 = arith.constant 0 : index
    %32 = vector.load %arg5[%c0_36, %c0_37] : memref<1x128xf32, #tpu.memory_space<vmem>>, vector<1x128xf32>
    %33 = vector.broadcast %32 : vector<1x128xf32> to vector<34x128xf32>
    %34 = arith.addf %31, %33 : vector<34x128xf32>
    %35 = vector.extract_strided_slice %34 {offsets = [0, 0], sizes = [16, 128], strides = [1, 1]} : vector<34x128xf32> to vector<16x128xf32>
    %c0_38 = arith.constant 0 : index
    %c0_39 = arith.constant 0 : index
    %c0_40 = arith.constant 0 : index
    %36 = vector.load %arg1[%c0_38, %c0_39, %c0_40] : memref<2x16x128xf32, #tpu.memory_space<vmem>>, vector<1x16x128xf32>
    %37 = vector.shape_cast %36 : vector<1x16x128xf32> to vector<16x128xf32>
    %38 = arith.addf %35, %37 : vector<16x128xf32>
    %cst_41 = arith.constant 0.000000e+00 : f32
    %39 = vector.broadcast %cst_41 : f32 to vector<16x128xf32>
    %40 = arith.maximumf %38, %39 : vector<16x128xf32>
    %c0_42 = arith.constant 0 : index
    %c0_43 = arith.constant 0 : index
    %c0_44 = arith.constant 0 : index
    %41 = vector.load %arg6[%c0_42, %c0_43, %c0_44] : memref<2x16x128xf32, #tpu.memory_space<vmem>>, vector<1x16x128xf32>
    %42 = vector.shape_cast %41 : vector<1x16x128xf32> to vector<16x128xf32>
    %43 = vector.shape_cast %40 : vector<16x128xf32> to vector<1x16x128xf32>
    tpu.vector_store %arg6[%c0_42, %c0_43, %c0_44], %43 {strides = array<i32>} : memref<2x16x128xf32, #tpu.memory_space<vmem>>, vector<1x16x128xf32>,
    %44 = vector.extract_strided_slice %34 {offsets = [18, 0], sizes = [16, 128], strides = [1, 1]} : vector<34x128xf32> to vector<16x128xf32>
    %c1_45 = arith.constant 1 : index
    %c0_46 = arith.constant 0 : index
    %c0_47 = arith.constant 0 : index
    %45 = vector.load %arg1[%c1_45, %c0_46, %c0_47] : memref<2x16x128xf32, #tpu.memory_space<vmem>>, vector<1x16x128xf32>
    %46 = vector.shape_cast %45 : vector<1x16x128xf32> to vector<16x128xf32>
    %47 = arith.addf %44, %46 : vector<16x128xf32>
    %cst_48 = arith.constant 0.000000e+00 : f32
    %48 = vector.broadcast %cst_48 : f32 to vector<16x128xf32>
    %49 = arith.maximumf %47, %48 : vector<16x128xf32>
    %c1_49 = arith.constant 1 : index
    %c0_50 = arith.constant 0 : index
    %c0_51 = arith.constant 0 : index
    %50 = vector.load %arg6[%c1_49, %c0_50, %c0_51] : memref<2x16x128xf32, #tpu.memory_space<vmem>>, vector<1x16x128xf32>
    %51 = vector.shape_cast %50 : vector<1x16x128xf32> to vector<16x128xf32>
    %52 = vector.shape_cast %49 : vector<16x128xf32> to vector<1x16x128xf32>
    tpu.vector_store %arg6[%c1_49, %c0_50, %c0_51], %52 {strides = array<i32>} : memref<2x16x128xf32, #tpu.memory_space<vmem>>, vector<1x16x128xf32>,
    return
  }
  func.func @transform_0(%arg0: i32) -> (i32, i32, i32) {
    %c0_i32 = arith.constant 0 : i32
    %c0_i32_0 = arith.constant 0 : i32
    %c0_i32_1 = arith.constant 0 : i32
    return %arg0, %c0_i32, %c0_i32_0 : i32, i32, i32
  }
  func.func @transform_1(%arg0: i32) -> (i32, i32) {
    %c0_i32 = arith.constant 0 : i32
    %c0_i32_0 = arith.constant 0 : i32
    %c0_i32_1 = arith.constant 0 : i32
    return %c0_i32, %c0_i32_0 : i32, i32
  }
  func.func @transform_2(%arg0: i32) -> (i32, i32) {
    %c0_i32 = arith.constant 0 : i32
    %c0_i32_0 = arith.constant 0 : i32
    %c0_i32_1 = arith.constant 0 : i32
    return %c0_i32, %c0_i32_0 : i32, i32
  }
  func.func @transform_3(%arg0: i32) -> (i32, i32) {
    %c0_i32 = arith.constant 0 : i32
    %c0_i32_0 = arith.constant 0 : i32
    %c0_i32_1 = arith.constant 0 : i32
    return %c0_i32, %c0_i32_0 : i32, i32
  }
  func.func @transform_4(%arg0: i32) -> (i32, i32) {
    %c0_i32 = arith.constant 0 : i32
    %c0_i32_0 = arith.constant 0 : i32
    %c0_i32_1 = arith.constant 0 : i32
    return %c0_i32, %c0_i32_0 : i32, i32
  }
  func.func @transform_5(%arg0: i32) -> (i32, i32, i32) {
    %c0_i32 = arith.constant 0 : i32
    %c0_i32_0 = arith.constant 0 : i32
    %c0_i32_1 = arith.constant 0 : i32
    return %arg0, %c0_i32, %c0_i32_0 : i32, i32, i32
  }
}

module attributes {stable_mosaic.version = 11 : i64} {
  func.func @basic_block_kernel(%arg0: i32, %arg1: memref<2x16x128xf32, #tpu.memory_space<vmem>>, %arg2: memref<384x128xf32, #tpu.memory_space<vmem>>, %arg3: memref<1x128xf32, #tpu.memory_space<vmem>>, %arg4: memref<384x128xf32, #tpu.memory_space<vmem>>, %arg5: memref<1x128xf32, #tpu.memory_space<vmem>>, %arg6: memref<2x16x128xf32, #tpu.memory_space<vmem>>, %arg7: memref<36x128xf32, #tpu.memory_space<vmem>>) attributes {dimension_semantics = [#tpu.dimension_semantics<parallel>], iteration_bounds = array<i64: 1>, scalar_prefetch = 0 : i64, scratch_operands = 1 : i64, tpu.core_type = #tpu.core_type<tc>, window_params = [{transform_indices = @transform_0, window_bounds = array<i64: 2, 16, 128>}, {pipeline_mode = #tpu.pipeline_mode<synchronous>, transform_indices = @transform_1, window_bounds = array<i64: 384, 128>}, {pipeline_mode = #tpu.pipeline_mode<synchronous>, transform_indices = @transform_2, window_bounds = array<i64: 1, 128>}, {pipeline_mode = #tpu.pipeline_mode<synchronous>, transform_indices = @transform_3, window_bounds = array<i64: 384, 128>}, {pipeline_mode = #tpu.pipeline_mode<synchronous>, transform_indices = @transform_4, window_bounds = array<i64: 1, 128>}, {transform_indices = @transform_5, window_bounds = array<i64: 2, 16, 128>}]} {
    %cst = arith.constant 0.000000e+00 : f32
    %0 = vector.broadcast %cst : f32 to vector<1x128xf32>
    %c0 = arith.constant 0 : index
    %c0_0 = arith.constant 0 : index
    %1 = vector.load %arg7[%c0, %c0_0] : memref<36x128xf32, #tpu.memory_space<vmem>>, vector<1x128xf32>
    tpu.vector_store %arg7[%c0, %c0_0], %0 {strides = array<i32>} : memref<36x128xf32, #tpu.memory_space<vmem>>, vector<1x128xf32>,
    %c17 = arith.constant 17 : index
    %c0_1 = arith.constant 0 : index
    %2 = vector.load %arg7[%c17, %c0_1] : memref<36x128xf32, #tpu.memory_space<vmem>>, vector<1x128xf32>
    tpu.vector_store %arg7[%c17, %c0_1], %0 {strides = array<i32>} : memref<36x128xf32, #tpu.memory_space<vmem>>, vector<1x128xf32>,
    %c18 = arith.constant 18 : index
    %c0_2 = arith.constant 0 : index
    %3 = vector.load %arg7[%c18, %c0_2] : memref<36x128xf32, #tpu.memory_space<vmem>>, vector<1x128xf32>
    tpu.vector_store %arg7[%c18, %c0_2], %0 {strides = array<i32>} : memref<36x128xf32, #tpu.memory_space<vmem>>, vector<1x128xf32>,
    %c35 = arith.constant 35 : index
    %c0_3 = arith.constant 0 : index
    %4 = vector.load %arg7[%c35, %c0_3] : memref<36x128xf32, #tpu.memory_space<vmem>>, vector<1x128xf32>
    tpu.vector_store %arg7[%c35, %c0_3], %0 {strides = array<i32>} : memref<36x128xf32, #tpu.memory_space<vmem>>, vector<1x128xf32>,
    %c0_4 = arith.constant 0 : index
    %c0_5 = arith.constant 0 : index
    %c0_6 = arith.constant 0 : index
    %5 = vector.load %arg1[%c0_4, %c0_5, %c0_6] : memref<2x16x128xf32, #tpu.memory_space<vmem>>, vector<1x16x128xf32>
    %6 = vector.shape_cast %5 : vector<1x16x128xf32> to vector<16x128xf32>
    %c1 = arith.constant 1 : index
    %c0_7 = arith.constant 0 : index
    %7 = vector.load %arg7[%c1, %c0_7] : memref<36x128xf32, #tpu.memory_space<vmem>>, vector<16x128xf32>
    tpu.vector_store %arg7[%c1, %c0_7], %6 {strides = array<i32>} : memref<36x128xf32, #tpu.memory_space<vmem>>, vector<16x128xf32>,
    %c1_8 = arith.constant 1 : index
    %c0_9 = arith.constant 0 : index
    %c0_10 = arith.constant 0 : index
    %8 = vector.load %arg1[%c1_8, %c0_9, %c0_10] : memref<2x16x128xf32, #tpu.memory_space<vmem>>, vector<1x16x128xf32>
    %9 = vector.shape_cast %8 : vector<1x16x128xf32> to vector<16x128xf32>
    %c19 = arith.constant 19 : index
    %c0_11 = arith.constant 0 : index
    %10 = vector.load %arg7[%c19, %c0_11] : memref<36x128xf32, #tpu.memory_space<vmem>>, vector<16x128xf32>
    tpu.vector_store %arg7[%c19, %c0_11], %9 {strides = array<i32>} : memref<36x128xf32, #tpu.memory_space<vmem>>, vector<16x128xf32>,
    %c0_12 = arith.constant 0 : index
    %c0_13 = arith.constant 0 : index
    %11 = vector.load %arg7[%c0_12, %c0_13] : memref<36x128xf32, #tpu.memory_space<vmem>>, vector<34x128xf32>
    %c1_14 = arith.constant 1 : index
    %c0_15 = arith.constant 0 : index
    %12 = vector.load %arg7[%c1_14, %c0_15] : memref<36x128xf32, #tpu.memory_space<vmem>>, vector<34x128xf32>
    %c2 = arith.constant 2 : index
    %c0_16 = arith.constant 0 : index
    %13 = vector.load %arg7[%c2, %c0_16] : memref<36x128xf32, #tpu.memory_space<vmem>>, vector<34x128xf32>
    %14 = tpu.concatenate %11, %12, %13 in 1 : vector<34x128xf32>, vector<34x128xf32>, vector<34x128xf32> -> vector<34x384xf32>
    %c0_17 = arith.constant 0 : index
    %c0_18 = arith.constant 0 : index
    %15 = vector.load %arg2[%c0_17, %c0_18] : memref<384x128xf32, #tpu.memory_space<vmem>>, vector<384x128xf32>
    %cst_19 = arith.constant dense<0.000000e+00> : vector<34x128xf32>
    %16 = tpu.matmul %14, %15, %cst_19 {dimension_numbers = #tpu.dot_dimension_numbers<[1], [0], [0], [1], [0, 0, 1, 1], [], []>} : vector<34x384xf32>, vector<384x128xf32>, vector<34x128xf32> -> vector<34x128xf32>
    %c0_20 = arith.constant 0 : index
    %c0_21 = arith.constant 0 : index
    %17 = vector.load %arg3[%c0_20, %c0_21] : memref<1x128xf32, #tpu.memory_space<vmem>>, vector<1x128xf32>
    %18 = vector.broadcast %17 : vector<1x128xf32> to vector<34x128xf32>
    %19 = arith.addf %16, %18 : vector<34x128xf32>
    %cst_22 = arith.constant 0.000000e+00 : f32
    %20 = vector.broadcast %cst_22 : f32 to vector<34x128xf32>
    %21 = arith.maximumf %19, %20 : vector<34x128xf32>
    %22 = vector.extract_strided_slice %21 {offsets = [0, 0], sizes = [16, 128], strides = [1, 1]} : vector<34x128xf32> to vector<16x128xf32>
    %c1_23 = arith.constant 1 : index
    %c0_24 = arith.constant 0 : index
    %23 = vector.load %arg7[%c1_23, %c0_24] : memref<36x128xf32, #tpu.memory_space<vmem>>, vector<16x128xf32>
    tpu.vector_store %arg7[%c1_23, %c0_24], %22 {strides = array<i32>} : memref<36x128xf32, #tpu.memory_space<vmem>>, vector<16x128xf32>,
    %24 = vector.extract_strided_slice %21 {offsets = [18, 0], sizes = [16, 128], strides = [1, 1]} : vector<34x128xf32> to vector<16x128xf32>
    %c19_25 = arith.constant 19 : index
    %c0_26 = arith.constant 0 : index
    %25 = vector.load %arg7[%c19_25, %c0_26] : memref<36x128xf32, #tpu.memory_space<vmem>>, vector<16x128xf32>
    tpu.vector_store %arg7[%c19_25, %c0_26], %24 {strides = array<i32>} : memref<36x128xf32, #tpu.memory_space<vmem>>, vector<16x128xf32>,
    %c0_27 = arith.constant 0 : index
    %c0_28 = arith.constant 0 : index
    %26 = vector.load %arg7[%c0_27, %c0_28] : memref<36x128xf32, #tpu.memory_space<vmem>>, vector<34x128xf32>
    %c1_29 = arith.constant 1 : index
    %c0_30 = arith.constant 0 : index
    %27 = vector.load %arg7[%c1_29, %c0_30] : memref<36x128xf32, #tpu.memory_space<vmem>>, vector<34x128xf32>
    %c2_31 = arith.constant 2 : index
    %c0_32 = arith.constant 0 : index
    %28 = vector.load %arg7[%c2_31, %c0_32] : memref<36x128xf32, #tpu.memory_space<vmem>>, vector<34x128xf32>
    %29 = tpu.concatenate %26, %27, %28 in 1 : vector<34x128xf32>, vector<34x128xf32>, vector<34x128xf32> -> vector<34x384xf32>
    %c0_33 = arith.constant 0 : index
    %c0_34 = arith.constant 0 : index
    %30 = vector.load %arg4[%c0_33, %c0_34] : memref<384x128xf32, #tpu.memory_space<vmem>>, vector<384x128xf32>
    %cst_35 = arith.constant dense<0.000000e+00> : vector<34x128xf32>
    %31 = tpu.matmul %29, %30, %cst_35 {dimension_numbers = #tpu.dot_dimension_numbers<[1], [0], [0], [1], [0, 0, 1, 1], [], []>} : vector<34x384xf32>, vector<384x128xf32>, vector<34x128xf32> -> vector<34x128xf32>
    %c0_36 = arith.constant 0 : index
    %c0_37 = arith.constant 0 : index
    %32 = vector.load %arg5[%c0_36, %c0_37] : memref<1x128xf32, #tpu.memory_space<vmem>>, vector<1x128xf32>
    %33 = vector.broadcast %32 : vector<1x128xf32> to vector<34x128xf32>
    %34 = arith.addf %31, %33 : vector<34x128xf32>
    %35 = vector.extract_strided_slice %34 {offsets = [0, 0], sizes = [16, 128], strides = [1, 1]} : vector<34x128xf32> to vector<16x128xf32>
    %c0_38 = arith.constant 0 : index
    %c0_39 = arith.constant 0 : index
    %c0_40 = arith.constant 0 : index
    %36 = vector.load %arg1[%c0_38, %c0_39, %c0_40] : memref<2x16x128xf32, #tpu.memory_space<vmem>>, vector<1x16x128xf32>
    %37 = vector.shape_cast %36 : vector<1x16x128xf32> to vector<16x128xf32>
    %38 = arith.addf %35, %37 : vector<16x128xf32>
    %cst_41 = arith.constant 0.000000e+00 : f32
    %39 = vector.broadcast %cst_41 : f32 to vector<16x128xf32>
    %40 = arith.maximumf %38, %39 : vector<16x128xf32>
    %c0_42 = arith.constant 0 : index
    %c0_43 = arith.constant 0 : index
    %c0_44 = arith.constant 0 : index
    %41 = vector.load %arg6[%c0_42, %c0_43, %c0_44] : memref<2x16x128xf32, #tpu.memory_space<vmem>>, vector<1x16x128xf32>
    %42 = vector.shape_cast %41 : vector<1x16x128xf32> to vector<16x128xf32>
    %43 = vector.shape_cast %40 : vector<16x128xf32> to vector<1x16x128xf32>
    tpu.vector_store %arg6[%c0_42, %c0_43, %c0_44], %43 {strides = array<i32>} : memref<2x16x128xf32, #tpu.memory_space<vmem>>, vector<1x16x128xf32>,
    %44 = vector.extract_strided_slice %34 {offsets = [18, 0], sizes = [16, 128], strides = [1, 1]} : vector<34x128xf32> to vector<16x128xf32>
    %c1_45 = arith.constant 1 : index
    %c0_46 = arith.constant 0 : index
    %c0_47 = arith.constant 0 : index
    %45 = vector.load %arg1[%c1_45, %c0_46, %c0_47] : memref<2x16x128xf32, #tpu.memory_space<vmem>>, vector<1x16x128xf32>
    %46 = vector.shape_cast %45 : vector<1x16x128xf32> to vector<16x128xf32>
    %47 = arith.addf %44, %46 : vector<16x128xf32>
    %cst_48 = arith.constant 0.000000e+00 : f32
    %48 = vector.broadcast %cst_48 : f32 to vector<16x128xf32>
    %49 = arith.maximumf %47, %48 : vector<16x128xf32>
    %c1_49 = arith.constant 1 : index
    %c0_50 = arith.constant 0 : index
    %c0_51 = arith.constant 0 : index
    %50 = vector.load %arg6[%c1_49, %c0_50, %c0_51] : memref<2x16x128xf32, #tpu.memory_space<vmem>>, vector<1x16x128xf32>
    %51 = vector.shape_cast %50 : vector<1x16x128xf32> to vector<16x128xf32>
    %52 = vector.shape_cast %49 : vector<16x128xf32> to vector<1x16x128xf32>
    tpu.vector_store %arg6[%c1_49, %c0_50, %c0_51], %52 {strides = array<i32>} : memref<2x16x128xf32, #tpu.memory_space<vmem>>, vector<1x16x128xf32>,
    return
  }
  func.func @transform_0(%arg0: i32) -> (i32, i32, i32) {
    %c0_i32 = arith.constant 0 : i32
    %c0_i32_0 = arith.constant 0 : i32
    %c0_i32_1 = arith.constant 0 : i32
    return %arg0, %c0_i32, %c0_i32_0 : i32, i32, i32
  }
  func.func @transform_1(%arg0: i32) -> (i32, i32) {
    %c0_i32 = arith.constant 0 : i32
    %c0_i32_0 = arith.constant 0 : i32
    %c0_i32_1 = arith.constant 0 : i32
    return %c0_i32, %c0_i32_0 : i32, i32
  }
  func.func @transform_2(%arg0: i32) -> (i32, i32) {
    %c0_i32 = arith.constant 0 : i32
    %c0_i32_0 = arith.constant 0 : i32
    %c0_i32_1 = arith.constant 0 : i32
    return %c0_i32, %c0_i32_0 : i32, i32
  }
  func.func @transform_3(%arg0: i32) -> (i32, i32) {
    %c0_i32 = arith.constant 0 : i32
    %c0_i32_0 = arith.constant 0 : i32
    %c0_i32_1 = arith.constant 0 : i32
    return %c0_i32, %c0_i32_0 : i32, i32
  }
  func.func @transform_4(%arg0: i32) -> (i32, i32) {
    %c0_i32 = arith.constant 0 : i32
    %c0_i32_0 = arith.constant 0 : i32
    %c0_i32_1 = arith.constant 0 : i32
    return %c0_i32, %c0_i32_0 : i32, i32
  }
  func.func @transform_5(%arg0: i32) -> (i32, i32, i32) {
    %c0_i32 = arith.constant 0 : i32
    %c0_i32_0 = arith.constant 0 : i32
    %c0_i32_1 = arith.constant 0 : i32
    return %arg0, %c0_i32, %c0_i32_0 : i32, i32, i32
  }
}

</mosaic_0001>

<bundles_post_ra>
// kernel: tpu_custom_call.1
= control target key start
LH: loop header
LB: loop body
LE: loop exit
PB: predicated region body
PF: predicated region fallthrough
CT: control target
= control target key end

     0   :  { %10 = vsyncpa [#allocation4], 0  ;;  %s1100_s0 = inlined_call_operand.hbm [shape: f32[2,16,128], index: 0, kind: input, shape index: {}]   ;;  %s1101_s1 = inlined_call_operand.hbm [shape: f32[384,128], index: 1, kind: input, shape index: {}]   ;;  %s1102_s2 = inlined_call_operand.vmem [shape: f32[1,128], index: 2, kind: input, shape index: {}]   ;;  %s1103_s3 = inlined_call_operand.hbm [shape: f32[384,128], index: 3, kind: input, shape index: {}]   ;;  %s1104_s4 = inlined_call_operand.vmem [shape: f32[1,128], index: 4, kind: input, shape index: {}]   ;;  %s1105_s5 = inlined_call_operand.hbm [shape: f32[2,16,128], index: 5, kind: output, shape index: {}]  }
   0x1   :  { %11 = vsyncpa [#allocation7], 0 }
   0x2   :  { %12 = vsyncpa [#allocation5], 0  ;;  %s958_s18 = smov [#allocation6]   ;;  %s959_s20 = smov [#allocation3]  }
   0x3   :  { %s30_s19 = sshll.u32 %s958_s18, 4  ;;  %s18_s21 = sshll.u32 %s959_s20, 4  ;;  %s31_s19 = int_to_ptr.vmem [resolvable:$true] %s30_s19  ;;  %s19_s21 = int_to_ptr.vmem [resolvable:$true] %s18_s21 }
   0x4   :  { %s880_s22 = scalar_lea.vmem %s31_s19, 6144  ;;  %p885_p1 = scmp.lt.s32.totalorder %s31_s19, %s31_s19 }
   0x5   :  { %p881_p0 = scmp.ne.s32.totalorder %s31_s19, %s880_s22  ;;  %p886_p2 = scmp.lt.s32.totalorder %s880_s22, %s880_s22 }
   0x7   :  { %p887_p3 = por %p886_p2, %p885_p1 }
   0x9   :  { %p888_p4 = pnand %p887_p3, %p881_p0 }
   0xb   :  { %891 = shalt.err (!%p888_p4)
}
   0xc   :  { %s960_s23 = smov 128   ;;  %s961_s24 = smov 8  }
   0xd   :  { %36 = dma.hbm_to_vmem [thread:$0]  %s1101_s1, 6144, %s31_s19, [#allocation7], %s960_s23, %s960_s23, %s961_s24  }
   0xe   :  { %s900_s27 = scalar_lea.vmem %s19_s21, 512  ;;  %p905_p6 = scmp.lt.s32.totalorder %s19_s21, %s19_s21 }
   0xf   :  { %p901_p5 = scmp.ne.s32.totalorder %s19_s21, %s900_s27  ;;  %p906_p7 = scmp.lt.s32.totalorder %s900_s27, %s900_s27 }
  0x11   :  { %p907_p8 = por %p906_p7, %p905_p6 }
  0x13   :  { %p908_p9 = pnand %p907_p8, %p901_p5 }
  0x15   :  { %911 = shalt.err (!%p908_p9)
}
  0x16   :  { %24 = dma.hbm_to_vmem [thread:$0]  %s1100_s0, 512, %s19_s21, [#allocation4], %s960_s23, %s960_s23, %s961_s24  }
  0x17   :  { %s962_s30 = smov [#allocation8]  }
  0x18   :  { %s44_s6 = sshll.u32 %s962_s30, 4  ;;  %s45_s6 = int_to_ptr.vmem [resolvable:$true] %s44_s6 }
  0x19   :  { %s920_s7 = scalar_lea.vmem %s45_s6, 6144  ;;  %p925_p11 = scmp.lt.s32.totalorder %s45_s6, %s45_s6 }
  0x1a   :  { %p921_p10 = scmp.ne.s32.totalorder %s45_s6, %s920_s7  ;;  %p926_p12 = scmp.lt.s32.totalorder %s920_s7, %s920_s7 }
  0x1c   :  { %p927_p13 = por %p926_p12, %p925_p11 }
  0x1e   :  { %p928_p0 = pnand %p927_p13, %p921_p10 }
  0x20   :  { %931 = shalt.err (!%p928_p0)
}
  0x21   :  { %50 = dma.hbm_to_vmem [thread:$0]  %s1103_s3, 6144, %s45_s6, [#allocation7], %s960_s23, %s960_s23, %s961_s24  }
  0x22   :  { %952 = dma.done.wait [#allocation4], 512  }
  0x23   :  { %953 = vsyncadd [#allocation4], 4294966784 }
  0x24   :  { %954 = dma.done.wait [#allocation7], 12288  }
  0x25   :  { %955 = vsyncadd [#allocation7], 4294955008  ;;  %v963_v0 = vmov 0.0   ;;  %vm964_vm0 = vmmov 0   ;;  %v121_v1 = vld [vmem:[#allocation6 + $0xf8] sm:$0xff]  ;;  %v120_v3 = vld [vmem:[#allocation6 + $0xf0] sm:$0xff] }
  0x26   :  { %770 = vmatprep.subr.mxu1 %v963_v0  ;;  %62 = vst [vmem:[#allocation2] sm:$0x1] %v963_v0  ;;  %63 = vst [vmem:[#allocation2 + $0x11] sm:$0x1] %v963_v0  ;;  %802 = vmatprep.mubr.msk.f32.mxu1 %vm964_vm0, %v963_v0  ;;  %v105_v2 = vld [vmem:[#allocation6 + $0x78] sm:$0xff]  ;;  %v104_v4 = vld [vmem:[#allocation6 + $0x70] sm:$0xff] }
  0x27   :  { %64 = vst [vmem:[#allocation2 + $0x12] sm:$0x1] %v963_v0  ;;  %65 = vst [vmem:[#allocation2 + $0x23] sm:$0x1] %v963_v0  ;;  %634 = vmatprep.subr.mxu0 %v121_v1  ;;  %v119_v5 = vld [vmem:[#allocation6 + $0xe8] sm:$0xff]  ;;  %v137_v6 = vld [vmem:[#allocation6 + $0x178] sm:$0xff] }
  0x28   :  { %635 = vmatpush3.msra.mxu0 %v105_v2  ;;  %v103_v7 = vld [vmem:[#allocation6 + $0x68] sm:$0xff]  ;;  %771 = vmatpush3.msra.mxu1 %v137_v6  ;;  %v136_v8 = vld [vmem:[#allocation6 + $0x170] sm:$0xff]  ;;  %v118_v9 = vld [vmem:[#allocation6 + $0xe0] sm:$0xff]  ;;  %vm597_vm1 = vcmask 1041408  }
  0x29   :  { %636 = vmatprep.subr.mxu0 %v120_v3  ;;  %772 = vmatprep.subr.mxu1 %v963_v0  ;;  %v135_v10 = vld [vmem:[#allocation6 + $0x168] sm:$0xff]  ;;  %v102_v11 = vld [vmem:[#allocation6 + $0x60] sm:$0xff]  ;;  %v117_v12 = vld [vmem:[#allocation6 + $0xd8] sm:$0xff] }
  0x2a   :  { %637 = vmatpush3.msra.mxu0 %v104_v4  ;;  %773 = vmatpush3.msra.mxu1 %v136_v8  ;;  %v134_v13 = vld [vmem:[#allocation6 + $0x160] sm:$0xff]  ;;  %v101_v14 = vld [vmem:[#allocation6 + $0x58] sm:$0xff]  ;;  %v116_v15 = vld [vmem:[#allocation6 + $0xd0] sm:$0xff] }
  0x2b   :  { %638 = vmatprep.subr.mxu0 %v119_v5  ;;  %774 = vmatprep.subr.mxu1 %v963_v0  ;;  %v133_v16 = vld [vmem:[#allocation6 + $0x158] sm:$0xff]  ;;  %v100_v17 = vld [vmem:[#allocation6 + $0x50] sm:$0xff]  ;;  %v115_v18 = vld [vmem:[#allocation6 + $0xc8] sm:$0xff] }
  0x2c   :  { %639 = vmatpush3.msra.mxu0 %v103_v7  ;;  %775 = vmatpush3.msra.mxu1 %v135_v10  ;;  %v132_v19 = vld [vmem:[#allocation6 + $0x150] sm:$0xff]  ;;  %v99_v20 = vld [vmem:[#allocation6 + $0x48] sm:$0xff]  ;;  %v114_v21 = vld [vmem:[#allocation6 + $0xc0] sm:$0xff] }
  0x2d   :  { %640 = vmatprep.subr.mxu0 %v118_v9  ;;  %776 = vmatprep.subr.mxu1 %v963_v0  ;;  %v131_v22 = vld [vmem:[#allocation6 + $0x148] sm:$0xff]  ;;  %v98_v23 = vld [vmem:[#allocation6 + $0x40] sm:$0xff]  ;;  %v113_v24 = vld [vmem:[#allocation6 + $0xb8] sm:$0xff] }
  0x2e   :  { %641 = vmatpush3.msra.mxu0 %v102_v11  ;;  %777 = vmatpush3.msra.mxu1 %v134_v13  ;;  %v130_v25 = vld [vmem:[#allocation6 + $0x140] sm:$0xff]  ;;  %v97_v26 = vld [vmem:[#allocation6 + $0x38] sm:$0xff]  ;;  %v112_v27 = vld [vmem:[#allocation6 + $0xb0] sm:$0xff] }
  0x2f   :  { %642 = vmatprep.subr.mxu0 %v117_v12  ;;  %778 = vmatprep.subr.mxu1 %v963_v0  ;;  %v1027_v28 = vld [vmem:[#allocation3] sm:$0xff]  ;;  %v129_v29 = vld [vmem:[#allocation6 + $0x138] sm:$0xff]  ;;  %v1031_v30 = vld [vmem:[#allocation3 + $0x8] sm:$0xff] }
  0x30   :  { %643 = vmatpush3.msra.mxu0 %v101_v14  ;;  %779 = vmatpush3.msra.mxu1 %v133_v16  ;;  %68 = vst [vmem:[#allocation2 + $0x1] sm:$0xff] %v1027_v28  ;;  %v1033_v31 = vld [vmem:[#allocation3 + $0x10] sm:$0xff]  ;;  %69 = vst [vmem:[#allocation2 + $0x9] sm:$0xff] %v1031_v30  ;;  %v1037_v33 = vld [vmem:[#allocation3 + $0x18] sm:$0xff] }
  0x31   :  { %644 = vmatprep.subr.mxu0 %v116_v15  ;;  %780 = vmatprep.subr.mxu1 %v963_v0  ;;  %v96_v32 = vld [vmem:[#allocation6 + $0x30] sm:$0xff]  ;;  %73 = vst [vmem:[#allocation2 + $0x13] sm:$0xff] %v1033_v31  ;;  %v111_v34 = vld [vmem:[#allocation6 + $0xa8] sm:$0xff]  ;;  %74 = vst [vmem:[#allocation2 + $0x1b] sm:$0xff] %v1037_v33 }
  0x32   :  { %645 = vmatpush3.msra.mxu0 %v100_v17  ;;  %781 = vmatpush3.msra.mxu1 %v132_v19  ;;  %v128_v35 = vld [vmem:[#allocation6 + $0x130] sm:$0xff]  ;;  %v95_v36 = vld [vmem:[#allocation6 + $0x28] sm:$0xff]  ;;  %v110_v37 = vld [vmem:[#allocation6 + $0xa0] sm:$0xff] }
  0x33   :  { %646 = vmatprep.subr.mxu0 %v115_v18  ;;  %782 = vmatprep.subr.mxu1 %v963_v0  ;;  %v127_v38 = vld [vmem:[#allocation6 + $0x128] sm:$0xff]  ;;  %v94_v39 = vld [vmem:[#allocation6 + $0x20] sm:$0xff]  ;;  %v109_v40 = vld [vmem:[#allocation6 + $0x98] sm:$0xff] }
  0x34   :  { %647 = vmatpush3.msra.mxu0 %v99_v20  ;;  %783 = vmatpush3.msra.mxu1 %v131_v22  ;;  %v126_v41 = vld [vmem:[#allocation6 + $0x120] sm:$0xff]  ;;  %v93_v42 = vld [vmem:[#allocation6 + $0x18] sm:$0xff]  ;;  %v108_v43 = vld [vmem:[#allocation6 + $0x90] sm:$0xff] }
  0x35   :  { %648 = vmatprep.subr.mxu0 %v114_v21  ;;  %784 = vmatprep.subr.mxu1 %v963_v0  ;;  %v125_v44 = vld [vmem:[#allocation6 + $0x118] sm:$0xff]  ;;  %v92_v45 = vld [vmem:[#allocation6 + $0x10] sm:$0xff]  ;;  %v107_v46 = vld [vmem:[#allocation6 + $0x88] sm:$0xff] }
  0x36   :  { %649 = vmatpush3.msra.mxu0 %v98_v23  ;;  %785 = vmatpush3.msra.mxu1 %v130_v25  ;;  %v91_v47 = vld [vmem:[#allocation6 + $0x8] sm:$0xff]  ;;  %v124_v48 = vld [vmem:[#allocation6 + $0x110] sm:$0xff]  ;;  %v106_v49 = vld [vmem:[#allocation6 + $0x80] sm:$0xff] }
  0x37   :  { %650 = vmatprep.subr.mxu0 %v113_v24  ;;  %786 = vmatprep.subr.mxu1 %v963_v0  ;;  %v90_v50 = vld [vmem:[#allocation6] sm:$0xff]  ;;  %v123_v51 = vld [vmem:[#allocation6 + $0x108] sm:$0xff]  ;;  %v75_v52 = vld [vmem:[#allocation2] sm:$0xff] }
  0x38   :  { %651 = vmatpush3.msra.mxu0 %v97_v26  ;;  %787 = vmatpush3.msra.mxu1 %v129_v29  ;;  %v122_v53 = vld [vmem:[#allocation6 + $0x100] sm:$0xff]  ;;  %v381_v55 = vld [vmem:[#allocation8 + $0xf8] sm:$0xff]  ;;  %v380_v58 = vld [vmem:[#allocation8 + $0xf0] sm:$0xff] }
  0x39   :  { %652 = vmatprep.subr.mxu0 %v112_v27  ;;  %788 = vmatprep.subr.mxu1 %v963_v0  ;;  %v85_v54 = vld [vmem:[#allocation2 + $0x2] sm:$0xff]  ;;  %v82_v59 = vld [vmem:[#allocation2 + $0x11] sm:$0xff]  ;;  %v83_v2 = vld [vmem:[#allocation2 + $0x19] sm:$0xff] }
  0x3a   :  { %653 = vmatpush3.msra.mxu0 %v96_v32  ;;  %789 = vmatpush3.msra.mxu1 %v128_v35  ;;  %v365_v56 = vld [vmem:[#allocation8 + $0x78] sm:$0xff]  ;;  %v76_v57 = vld [vmem:[#allocation2 + $0x8] sm:$0xff]  ;;  %v364_v60 = vld [vmem:[#allocation8 + $0x70] sm:$0xff] }
  0x3b   :  { %654 = vmatprep.subr.mxu0 %v111_v34  ;;  %790 = vmatprep.subr.mxu1 %v963_v0  ;;  %v86_v61 = vld [vmem:[#allocation2 + $0xa] sm:$0xff]  ;;  %v397_v1 = vld [vmem:[#allocation8 + $0x178] sm:$0xff]  ;;  %v87_v4 = vld [vmem:[#allocation2 + $0x12] sm:$0xff] }
  0x3c   :  { %655 = vmatpush3.msra.mxu0 %v95_v36  ;;  %791 = vmatpush3.msra.mxu1 %v127_v38  ;;  %v379_v62 = vld [vmem:[#allocation8 + $0xe8] sm:$0xff]  ;;  %v378_v5 = vld [vmem:[#allocation8 + $0xe0] sm:$0xff]  ;;  %v78_v6 = vld [vmem:[#allocation2 + $0x18] sm:$0xff] }
  0x3d   :  { %656 = vmatprep.subr.mxu0 %v110_v37  ;;  %792 = vmatprep.subr.mxu1 %v963_v0  ;;  %v77_v63 = vld [vmem:[#allocation2 + $0x10] sm:$0xff]  ;;  %v396_v7 = vld [vmem:[#allocation8 + $0x170] sm:$0xff]  ;;  %v84_v8 = vld [vmem:[#allocation2 + $0x21] sm:$0x3] }
  0x3e   :  { %657 = vmatpush3.msra.mxu0 %v94_v39  ;;  %793 = vmatpush3.msra.mxu1 %v126_v41  ;;  %v363_v3 = vld [vmem:[#allocation8 + $0x68] sm:$0xff]  ;;  %v362_v9 = vld [vmem:[#allocation8 + $0x60] sm:$0xff]  ;;  %v88_v10 = vld [vmem:[#allocation2 + $0x1a] sm:$0xff] }
  0x3f   :  { %658 = vmatprep.subr.mxu0 %v109_v40  ;;  %794 = vmatprep.subr.mxu1 %v963_v0  ;;  %v377_v11 = vld [vmem:[#allocation8 + $0xd8] sm:$0xff]  ;;  %v395_v13 = vld [vmem:[#allocation8 + $0x168] sm:$0xff]  ;;  %v376_v16 = vld [vmem:[#allocation8 + $0xd0] sm:$0xff] }
  0x40   :  { %659 = vmatpush3.msra.mxu0 %v93_v42  ;;  %795 = vmatpush3.msra.mxu1 %v125_v44  ;;  %v79_v12 = vld [vmem:[#allocation2 + $0x20] sm:$0x3]  ;;  %v89_v15 = vld [vmem:[#allocation2 + $0x22] sm:$0x3]  ;;  %v394_v17 = vld [vmem:[#allocation8 + $0x160] sm:$0xff] }
  0x41   :  { %660 = vmatprep.subr.mxu0 %v108_v43  ;;  %796 = vmatprep.subr.mxu1 %v963_v0  ;;  %v361_v14 = vld [vmem:[#allocation8 + $0x58] sm:$0xff]  ;;  %v360_v18 = vld [vmem:[#allocation8 + $0x50] sm:$0xff]  ;;  %v375_v19 = vld [vmem:[#allocation8 + $0xc8] sm:$0xff] }
  0x42   :  { %661 = vmatpush3.msra.mxu0 %v92_v45  ;;  %209 = vmatprep.mubr.f32.mxu0 %v1027_v28  ;;  %v393_v20 = vld [vmem:[#allocation8 + $0x158] sm:$0xff]  ;;  %v359_v21 = vld [vmem:[#allocation8 + $0x48] sm:$0xff]  ;;  %v374_v22 = vld [vmem:[#allocation8 + $0xc0] sm:$0xff] }
  0x43   :  { %662 = vmatprep.subr.mxu0 %v107_v46  ;;  %797 = vmatpush3.msra.mxu1 %v124_v48  ;;  %v392_v23 = vld [vmem:[#allocation8 + $0x150] sm:$0xff]  ;;  %v358_v24 = vld [vmem:[#allocation8 + $0x40] sm:$0xff]  ;;  %v373_v25 = vld [vmem:[#allocation8 + $0xb8] sm:$0xff] }
  0x44   :  { %663 = vmatpush3.msra.mxu0 %v91_v47  ;;  %798 = vmatprep.subr.mxu1 %v963_v0  ;;  %v391_v26 = vld [vmem:[#allocation8 + $0x148] sm:$0xff]  ;;  %v357_v27 = vld [vmem:[#allocation8 + $0x38] sm:$0xff]  ;;  %v372_v29 = vld [vmem:[#allocation8 + $0xb0] sm:$0xff] }
  0x45   :  { %664 = vmatprep.subr.mxu0 %v106_v49  ;;  %799 = vmatpush3.msra.mxu1 %v123_v51  ;;  %v390_v32 = vld [vmem:[#allocation8 + $0x140] sm:$0xff]  ;;  %v356_v34 = vld [vmem:[#allocation8 + $0x30] sm:$0xff]  ;;  %v371_v35 = vld [vmem:[#allocation8 + $0xa8] sm:$0xff] }
  0x46   :  { %665 = vmatpush3.msra.mxu0 %v90_v50  ;;  %800 = vmatprep.subr.mxu1 %v963_v0  ;;  %v389_v36 = vld [vmem:[#allocation8 + $0x138] sm:$0xff]  ;;  %v355_v37 = vld [vmem:[#allocation8 + $0x28] sm:$0xff]  ;;  %v370_v38 = vld [vmem:[#allocation8 + $0xa0] sm:$0xff] }
  0x47   :  { %210 = vmatmul.mubr.f32.vlgmr.msra.gmra.mxu0 %v75_v52  ;;  %801 = vmatpush3.msra.mxu1 %v122_v53  ;;  %v388_v39 = vld [vmem:[#allocation8 + $0x130] sm:$0xff]  ;;  %v354_v40 = vld [vmem:[#allocation8 + $0x20] sm:$0xff]  ;;  %v369_v41 = vld [vmem:[#allocation8 + $0x98] sm:$0xff] }
  0x48   :  { %214 = vmatprep.mubr.f32.mxu0 %v1031_v30  ;;  %803 = vmatmul.mubr.f32.vlgmr.msra.gmra.mxu1 %v85_v54  ;;  %v387_v42 = vld [vmem:[#allocation8 + $0x128] sm:$0xff]  ;;  %v353_v43 = vld [vmem:[#allocation8 + $0x18] sm:$0xff]  ;;  %v368_v44 = vld [vmem:[#allocation8 + $0x90] sm:$0xff] }
  0x49   :  { %702 = vmatprep.subr.mxu0 %v381_v55  ;;  %805 = vmatprep.mubr.msk.f32.mxu1 %vm964_vm0, %v963_v0  ;;  %v386_v45 = vld [vmem:[#allocation8 + $0x120] sm:$0xff]  ;;  %v352_v46 = vld [vmem:[#allocation8 + $0x10] sm:$0xff]  ;;  %v367_v47 = vld [vmem:[#allocation8 + $0x88] sm:$0xff] }
  0x4a   :  { %703 = vmatpush3.msra.mxu0 %v365_v56  ;;  %817 = vmatprep.subr.mxu1 %v963_v0  ;;  %v385_v48 = vld [vmem:[#allocation8 + $0x118] sm:$0xff]  ;;  %v351_v49 = vld [vmem:[#allocation8 + $0x8] sm:$0xff]  ;;  %v366_v50 = vld [vmem:[#allocation8 + $0x80] sm:$0xff] }
  0x4b   :  { %215 = vmatmul.mubr.f32.gmra.mxu0 %v76_v57  ;;  %704 = vmatprep.subr.mxu0 %v380_v58  ;;  %v384_v51 = vld [vmem:[#allocation8 + $0x110] sm:$0xff]  ;;  %v350_v52 = vld [vmem:[#allocation8] sm:$0xff]  ;;  %v383_v53 = vld [vmem:[#allocation8 + $0x108] sm:$0xff] }
  0x4c   :  { %219 = vmatprep.mubr.f32.mxu0 %v82_v59  ;;  %705 = vmatpush3.msra.mxu0 %v364_v60  ;;  %v382_v54 = vld [vmem:[#allocation8 + $0x100] sm:$0xff]  ;;  %v632_v57 = vld [vmem:[%s1102_s2] ss:$0 sm:$0xff] }
  0x4d   :  { %806 = vmatmul.mubr.f32.gmra.mxu1 %v86_v61  ;;  %706 = vmatprep.subr.mxu0 %v379_v62 }
  0x4e   :  { %808 = vmatprep.mubr.msk.f32.mxu1 %vm964_vm0, %v963_v0  ;;  %818 = vmatpush3.msra.mxu1 %v397_v1 }
  0x4f   :  { %220 = vmatmul.mubr.f32.gmra.mxu0 %v77_v63  ;;  %819 = vmatprep.subr.mxu1 %v963_v0 }
  0x50   :  { %224 = vmatprep.mubr.f32.mxu0 %v83_v2  ;;  %707 = vmatpush3.msra.mxu0 %v363_v3 }
  0x51   :  { %809 = vmatmul.mubr.f32.gmra.mxu1 %v87_v4  ;;  %708 = vmatprep.subr.mxu0 %v378_v5 }
  0x52   :  { %811 = vmatprep.mubr.msk.f32.mxu1 %vm964_vm0, %v963_v0  ;;  %820 = vmatpush3.msra.mxu1 %v396_v7 }
  0x53   :  { %225 = vmatmul.mubr.f32.gmra.mxu0 %v78_v6  ;;  %821 = vmatprep.subr.mxu1 %v963_v0 }
  0x54   :  { %229 = vmatprep.mubr.f32.mxu0 %v84_v8  ;;  %709 = vmatpush3.msra.mxu0 %v362_v9 }
  0x55   :  { %812 = vmatmul.mubr.f32.gmra.mxu1 %v88_v10  ;;  %710 = vmatprep.subr.mxu0 %v377_v11 }
  0x56   :  { %814 = vmatprep.mubr.msk.f32.mxu1 %vm964_vm0, %v963_v0  ;;  %822 = vmatpush3.msra.mxu1 %v395_v13 }
  0x57   :  { %230 = vmatmul.mubr.f32.gmra.mxu0 %v79_v12  ;;  %823 = vmatprep.subr.mxu1 %v963_v0 }
  0x58   :  { %711 = vmatpush3.msra.mxu0 %v361_v14  ;;  %824 = vmatpush3.msra.mxu1 %v394_v17 }
  0x59   :  { %815 = vmatmul.mubr.f32.gmra.mxu1 %v89_v15  ;;  %712 = vmatprep.subr.mxu0 %v376_v16 }
  0x5a   :  { %713 = vmatpush3.msra.mxu0 %v360_v18  ;;  %825 = vmatprep.subr.mxu1 %v963_v0 }
  0x5b   :  { %849 = vmatprep.mubr.msk.f32.mxu1 %vm964_vm0, %v963_v0  ;;  %714 = vmatprep.subr.mxu0 %v375_v19 }
  0x5c   :  { %826 = vmatpush3.msra.mxu1 %v393_v20  ;;  %715 = vmatpush3.msra.mxu0 %v359_v21 }
  0x5d   :  { %827 = vmatprep.subr.mxu1 %v963_v0  ;;  %716 = vmatprep.subr.mxu0 %v374_v22 }
  0x5e   :  { %828 = vmatpush3.msra.mxu1 %v392_v23  ;;  %717 = vmatpush3.msra.mxu0 %v358_v24 }
  0x5f   :  { %829 = vmatprep.subr.mxu1 %v963_v0  ;;  %718 = vmatprep.subr.mxu0 %v373_v25 }
  0x60   :  { %830 = vmatpush3.msra.mxu1 %v391_v26  ;;  %719 = vmatpush3.msra.mxu0 %v357_v27 }
  0x61   :  { %831 = vmatprep.subr.mxu1 %v963_v0  ;;  %720 = vmatprep.subr.mxu0 %v372_v29 }
  0x62   :  { %832 = vmatpush3.msra.mxu1 %v390_v32  ;;  %721 = vmatpush3.msra.mxu0 %v356_v34 }
  0x63   :  { %833 = vmatprep.subr.mxu1 %v963_v0  ;;  %722 = vmatprep.subr.mxu0 %v371_v35 }
  0x64   :  { %834 = vmatpush3.msra.mxu1 %v389_v36  ;;  %723 = vmatpush3.msra.mxu0 %v355_v37 }
  0x65   :  { %835 = vmatprep.subr.mxu1 %v963_v0  ;;  %724 = vmatprep.subr.mxu0 %v370_v38 }
  0x66   :  { %836 = vmatpush3.msra.mxu1 %v388_v39  ;;  %725 = vmatpush3.msra.mxu0 %v354_v40 }
  0x67   :  { %837 = vmatprep.subr.mxu1 %v963_v0  ;;  %726 = vmatprep.subr.mxu0 %v369_v41 }
  0x68   :  { %838 = vmatpush3.msra.mxu1 %v387_v42  ;;  %727 = vmatpush3.msra.mxu0 %v353_v43 }
  0x69   :  { %839 = vmatprep.subr.mxu1 %v963_v0  ;;  %728 = vmatprep.subr.mxu0 %v368_v44 }
  0x6a   :  { %840 = vmatpush3.msra.mxu1 %v386_v45  ;;  %729 = vmatpush3.msra.mxu0 %v352_v46 }
  0x6b   :  { %841 = vmatprep.subr.mxu1 %v963_v0  ;;  %730 = vmatprep.subr.mxu0 %v367_v47 }
  0x6c   :  { %842 = vmatpush3.msra.mxu1 %v385_v48  ;;  %731 = vmatpush3.msra.mxu0 %v351_v49 }
  0x6d   :  { %843 = vmatprep.subr.mxu1 %v963_v0  ;;  %732 = vmatprep.subr.mxu0 %v366_v50 }
  0x6e   :  { %844 = vmatpush3.msra.mxu1 %v384_v51  ;;  %733 = vmatpush3.msra.mxu0 %v350_v52  ;;  %v633_v51 = vld [vmem:[%s1104_s4] ss:$0 sm:$0xff]  ;;  %s965_s4 = smov [#allocation9]  }
  0x6f   :  { %845 = vmatprep.subr.mxu1 %v963_v0  ;;  %s619_s10 = sshll.u32 %s965_s4, 4  ;;  %s620_s10 = int_to_ptr.vmem [resolvable:$true] %s619_s10 }
  0x70   :  { %846 = vmatpush3.msra.mxu1 %v383_v53  ;;  %s932_s11 = scalar_lea.vmem %s620_s10, 512  ;;  %p937_p2 = scmp.lt.s32.totalorder %s620_s10, %s620_s10 }
  0x71   :  { %847 = vmatprep.subr.mxu1 %v963_v0  ;;  %p933_p1 = scmp.ne.s32.totalorder %s620_s10, %s932_s11  ;;  %p938_p3 = scmp.lt.s32.totalorder %s932_s11, %s932_s11 }
  0x72   :  { %848 = vmatpush3.msra.mxu1 %v382_v54 }
  0x73   :  { %p939_p4 = por %p938_p3, %p937_p2 }
  0x75   :  { %p940_p5 = pnand %p939_p4, %p933_p1 }
 0x107   :  { %v666_v55 = vpop.f32.mrf.mxu0 }
 0x108   :  { %v301_v58 = vpop.f32.mrf.mxu1 }
 0x109   :  { %v667_v56 = vpop.f32.mrf.mxu0 }
 0x10a   :  { %v668_v59 = vadd.f32 %v667_v56, %v666_v55  ;;  %v804_v61 = vpop.f32.mrf.mxu1 }
 0x10b   :  { %v669_v60 = vpop.f32.mrf.mxu0 }
 0x10c   :  { %v212_v62 = vadd.f32 %v668_v59, %v632_v57 }
 0x10d   :  { %v670_v63 = vpop.f32.mrf.mxu0  ;;  %v306_v1 = vpop.f32.mrf.mxu1 }
 0x10e   :  { %v302_v2 = vadd.f32 %v301_v58, %v212_v62  ;;  %v671_v3 = vadd.f32 %v670_v63, %v669_v60 }
 0x10f   :  { %v672_v4 = vpop.f32.mrf.mxu0  ;;  %v807_v5 = vpop.f32.mrf.mxu1 }
 0x110   :  { %v325_v6 = vmax.f32 %v302_v2, 0.0  ;;  %v217_v7 = vadd.f32 %v671_v3, %v632_v57 }
 0x111   :  { %v673_v8 = vpop.f32.mrf.mxu0  ;;  %v311_v9 = vpop.f32.mrf.mxu1 }
 0x112   :  { %330 = vst [vmem:[#allocation2 + $0x1] sm:$0xff] %v325_v6  ;;  %v307_v10 = vadd.f32 %v306_v1, %v217_v7  ;;  %v674_v11 = vadd.f32 %v673_v8, %v672_v4  ;;  %469 = vmatprep.mubr.f32.mxu0 %v325_v6 }
 0x113   :  { %v675_v12 = vpop.f32.mrf.mxu0  ;;  %v810_v13 = vpop.f32.mrf.mxu1 }
 0x114   :  { %v326_v14 = vmax.f32 %v307_v10, 0.0  ;;  %v222_v15 = vadd.f32 %v674_v11, %v632_v57 }
 0x115   :  { %v676_v16 = vpop.f32.mrf.mxu0  ;;  %v316_v17 = vpop.f32.mrf.mxu1 }
 0x116   :  { %331 = vst [vmem:[#allocation2 + $0x9] sm:$0xff] %v326_v14  ;;  %v312_v18 = vadd.f32 %v311_v9, %v222_v15  ;;  %v677_v19 = vadd.f32 %v676_v16, %v675_v12  ;;  %v598_v9 = vrot.slane %v1033_v31, 6 }
 0x117   :  { %v678_v20 = vpop.f32.mrf.mxu0  ;;  %v813_v21 = vpop.f32.mrf.mxu1 }
 0x118   :  { %v327_v22 = vmax.f32 %v312_v18, 0.0  ;;  %v227_v23 = vadd.f32 %v677_v19, %v632_v57 }
 0x119   :  { %v679_v24 = vpop.f32.mrf.mxu0  ;;  %v321_v25 = vpop.f32.mrf.mxu1  ;;  %v335_v26 = vld [vmem:[#allocation2] sm:$0xff] }
 0x11a   :  { %332 = vst [vmem:[#allocation2 + $0x11] sm:$0xfc] %v327_v22  ;;  %v317_v27 = vadd.f32 %v316_v17, %v227_v23  ;;  %v680_v29 = vadd.f32 %v679_v24, %v678_v20  ;;  %470 = vmatmul.mubr.f32.vlgmr.msra.gmra.mxu0 %v335_v26 }
 0x11b   :  { %v816_v32 = vpop.f32.mrf.mxu1  ;;  %474 = vmatprep.mubr.f32.mxu0 %v326_v14 }
 0x11c   :  { %v328_v34 = vmax.f32 %v317_v27, 0.0  ;;  %v232_v35 = vadd.f32 %v680_v29, %v632_v57 }
 0x11d   :  { %v345_v36 = vld [vmem:[#allocation2 + $0x2] sm:$0xff]  ;;  %v346_v41 = vld [vmem:[#allocation2 + $0xa] sm:$0xff] }
 0x11e   :  { %v336_v37 = vld [vmem:[#allocation2 + $0x8] sm:$0xff]  ;;  %333 = vst [vmem:[#allocation2 + $0x19] sm:$0xff] %v328_v34  ;;  %v322_v38 = vadd.f32 %v321_v25, %v232_v35  ;;  %850 = vmatmul.mubr.f32.vlgmr.msra.gmra.mxu1 %v345_v36 }
 0x11f   :  { %475 = vmatmul.mubr.f32.gmra.mxu0 %v336_v37  ;;  %852 = vmatprep.mubr.msk.f32.mxu1 %vm964_vm0, %v963_v0 }
 0x120   :  { %v329_v39 = vmax.f32 %v322_v38, 0.0 }
 0x121   :  { %v342_v40 = vld [vmem:[#allocation2 + $0x11] sm:$0xff] }
 0x122   :  { %v337_v42 = vld [vmem:[#allocation2 + $0x10] sm:$0xff]  ;;  %334 = vst [vmem:[#allocation2 + $0x21] sm:$0x3] %v329_v39  ;;  %479 = vmatprep.mubr.f32.mxu0 %v342_v40  ;;  %853 = vmatmul.mubr.f32.gmra.mxu1 %v346_v41 }
 0x123   :  { %480 = vmatmul.mubr.f32.gmra.mxu0 %v337_v42  ;;  %855 = vmatprep.mubr.msk.f32.mxu1 %vm964_vm0, %v963_v0 }
 0x124   :  { %484 = vmatprep.mubr.f32.mxu0 %v328_v34 }
 0x125   :  { %v347_v43 = vld [vmem:[#allocation2 + $0x12] sm:$0xff] }
 0x126   :  { %v338_v44 = vld [vmem:[#allocation2 + $0x18] sm:$0xff]  ;;  %856 = vmatmul.mubr.f32.gmra.mxu1 %v347_v43 }
 0x127   :  { %485 = vmatmul.mubr.f32.gmra.mxu0 %v338_v44  ;;  %858 = vmatprep.mubr.msk.f32.mxu1 %vm964_vm0, %v963_v0 }
 0x129   :  { %v344_v45 = vld [vmem:[#allocation2 + $0x21] sm:$0x3] }
 0x12a   :  { %v348_v46 = vld [vmem:[#allocation2 + $0x1a] sm:$0xff]  ;;  %489 = vmatprep.mubr.f32.mxu0 %v344_v45  ;;  %v349_v48 = vld [vmem:[#allocation2 + $0x22] sm:$0x3] }
 0x12b   :  { %v339_v47 = vld [vmem:[#allocation2 + $0x20] sm:$0x3]  ;;  %859 = vmatmul.mubr.f32.gmra.mxu1 %v348_v46 }
 0x12c   :  { %490 = vmatmul.mubr.f32.gmra.mxu0 %v339_v47  ;;  %861 = vmatprep.mubr.msk.f32.mxu1 %vm964_vm0, %v963_v0 }
 0x12f   :  { %862 = vmatmul.mubr.f32.gmra.mxu1 %v349_v48 }
 0x1da   :  { %v734_v49 = vpop.f32.mrf.mxu0 }
 0x1dc   :  { %v735_v50 = vpop.f32.mrf.mxu0 }
 0x1dd   :  { %v736_v52 = vadd.f32 %v735_v50, %v734_v49 }
 0x1de   :  { %v561_v53 = vpop.f32.mrf.mxu1 }
 0x1df   :  { %v737_v54 = vpop.f32.mrf.mxu0  ;;  %v472_v55 = vadd.f32 %v736_v52, %v633_v51 }
 0x1e0   :  { %v851_v56 = vpop.f32.mrf.mxu1 }
 0x1e1   :  { %v738_v57 = vpop.f32.mrf.mxu0  ;;  %v562_v58 = vadd.f32 %v561_v53, %v472_v55 }
 0x1e2   :  { %v739_v59 = vadd.f32 %v738_v57, %v737_v54  ;;  %v566_v60 = vpop.f32.mrf.mxu1 }
 0x1e3   :  { %v587_v61 = vadd.f32 %v562_v58, %v1027_v28  ;;  %v740_v62 = vpop.f32.mrf.mxu0  ;;  %v599_v28 = vrot.slane %v1037_v33, 6 }
 0x1e4   :  { %v477_v0 = vadd.f32 %v739_v59, %v633_v51  ;;  %v854_v63 = vpop.f32.mrf.mxu1 }
 0x1e5   :  { %v589_v1 = vmax.f32 %v587_v61, 0.0  ;;  %v741_v3 = vpop.f32.mrf.mxu0  ;;  %v600_v20 = vsel %vm597_vm1, %v598_v9, %v599_v28 }
 0x1e6   :  { %v567_v2 = vadd.f32 %v566_v60, %v477_v0  ;;  %v742_v4 = vadd.f32 %v741_v3, %v740_v62  ;;  %v571_v5 = vpop.f32.mrf.mxu1 }
 0x1e7   :  { %591 = vst [vmem:[#allocation9] sm:$0xff] %v589_v1  ;;  %v743_v7 = vpop.f32.mrf.mxu0 }
 0x1e8   :  { %v588_v6 = vadd.f32 %v567_v2, %v1031_v30  ;;  %v482_v8 = vadd.f32 %v742_v4, %v633_v51  ;;  %v857_v10 = vpop.f32.mrf.mxu1 }
 0x1e9   :  { %v744_v12 = vpop.f32.mrf.mxu0 }
 0x1ea   :  { %v590_v11 = vmax.f32 %v588_v6, 0.0  ;;  %v572_v13 = vadd.f32 %v571_v5, %v482_v8  ;;  %v745_v14 = vadd.f32 %v744_v12, %v743_v7 }
 0x1eb   :  { %v576_v15 = vpop.f32.mrf.mxu1 }
 0x1ec   :  { %592 = vst [vmem:[#allocation9 + $0x8] sm:$0xff] %v590_v11  ;;  %v746_v16 = vpop.f32.mrf.mxu0  ;;  %v604_v17 = vadd.f32 %v598_v9, %v572_v13  ;;  %v487_v18 = vadd.f32 %v745_v14, %v633_v51 }
 0x1ed   :  { %v860_v19 = vpop.f32.mrf.mxu1 }
 0x1ee   :  { %v747_v30 = vpop.f32.mrf.mxu0  ;;  %v607_v21 = vmax.f32 %v604_v17, 0.0  ;;  %v577_v22 = vadd.f32 %v576_v15, %v487_v18 }
 0x1ef   :  { %v748_v23 = vadd.f32 %v747_v30, %v746_v16  ;;  %v581_v31 = vpop.f32.mrf.mxu1 }
 0x1f0   :  { %611 = vst [vmem:[#allocation9 + $0xe] sm:$0xfc] %v607_v21  ;;  %v605_v24 = vadd.f32 %v600_v20, %v577_v22 }
 0x1f1   :  { %v492_v25 = vadd.f32 %v748_v23, %v633_v51  ;;  %v863_v26 = vpop.f32.mrf.mxu1 }
 0x1f2   :  { %v608_v33 = vmax.f32 %v605_v24, 0.0 }
 0x1f3   :  { %v582_v27 = vadd.f32 %v581_v31, %v492_v25 }
 0x1f4   :  { %612 = vst [vmem:[#allocation9 + $0x16] sm:$0xff] %v608_v33 }
 0x1f5   :  { %v606_v29 = vadd.f32 %v599_v28, %v582_v27 }
 0x1f7   :  { %v609_v32 = vmax.f32 %v606_v29, 0.0 }
 0x1f9   :  { %613 = vst [vmem:[#allocation9 + $0x1e] sm:$0x3] %v609_v32 }
 0x1fa   :  { %943 = shalt.err (!%p940_p5)
}
 0x1fb   :  { %625 = dma.vmem_to_hbm [thread:$0]  %s620_s10, 512, %s1105_s5, [#allocation5], %s960_s23, %s960_s23, %s961_s24  }
 0x1fc   :  { %956 = dma.done.wait [#allocation5], 512  }
 0x1fd   :  { %957 = vsyncadd [#allocation5], 4294966784 }
 0x1fe   :  { %629 = vsyncpa [#allocation4], 1 }
 0x1ff   :  { %630 = vsyncpa [#allocation7], 1 }
 0x200   :  { %631 = vsyncpa [#allocation5], 1 }

// kernel: tpu_custom_call.1
= control target key start
LH: loop header
LB: loop body
LE: loop exit
PB: predicated region body
PF: predicated region fallthrough
CT: control target
= control target key end

     0   :  { %10 = vsyncpa [#allocation4], 0  ;;  %s1100_s0 = inlined_call_operand.hbm [shape: f32[2,16,128], index: 0, kind: input, shape index: {}]   ;;  %s1101_s1 = inlined_call_operand.hbm [shape: f32[384,128], index: 1, kind: input, shape index: {}]   ;;  %s1102_s2 = inlined_call_operand.vmem [shape: f32[1,128], index: 2, kind: input, shape index: {}]   ;;  %s1103_s3 = inlined_call_operand.hbm [shape: f32[384,128], index: 3, kind: input, shape index: {}]   ;;  %s1104_s4 = inlined_call_operand.vmem [shape: f32[1,128], index: 4, kind: input, shape index: {}]   ;;  %s1105_s5 = inlined_call_operand.hbm [shape: f32[2,16,128], index: 5, kind: output, shape index: {}]  }
   0x1   :  { %11 = vsyncpa [#allocation7], 0 }
   0x2   :  { %12 = vsyncpa [#allocation5], 0  ;;  %s958_s18 = smov [#allocation6]   ;;  %s959_s20 = smov [#allocation3]  }
   0x3   :  { %s30_s19 = sshll.u32 %s958_s18, 4  ;;  %s18_s21 = sshll.u32 %s959_s20, 4  ;;  %s31_s19 = int_to_ptr.vmem [resolvable:$true] %s30_s19  ;;  %s19_s21 = int_to_ptr.vmem [resolvable:$true] %s18_s21 }
   0x4   :  { %s880_s22 = scalar_lea.vmem %s31_s19, 6144  ;;  %p885_p1 = scmp.lt.s32.totalorder %s31_s19, %s31_s19 }
   0x5   :  { %p881_p0 = scmp.ne.s32.totalorder %s31_s19, %s880_s22  ;;  %p886_p2 = scmp.lt.s32.totalorder %s880_s22, %s880_s22 }
   0x7   :  { %p887_p3 = por %p886_p2, %p885_p1 }
   0x9   :  { %p888_p4 = pnand %p887_p3, %p881_p0 }
   0xb   :  { %891 = shalt.err (!%p888_p4)
}
   0xc   :  { %s960_s23 = smov 128   ;;  %s961_s24 = smov 8  }
   0xd   :  { %36 = dma.hbm_to_vmem [thread:$0]  %s1101_s1, 6144, %s31_s19, [#allocation7], %s960_s23, %s960_s23, %s961_s24  }
   0xe   :  { %s900_s27 = scalar_lea.vmem %s19_s21, 512  ;;  %p905_p6 = scmp.lt.s32.totalorder %s19_s21, %s19_s21 }
   0xf   :  { %p901_p5 = scmp.ne.s32.totalorder %s19_s21, %s900_s27  ;;  %p906_p7 = scmp.lt.s32.totalorder %s900_s27, %s900_s27 }
  0x11   :  { %p907_p8 = por %p906_p7, %p905_p6 }
  0x13   :  { %p908_p9 = pnand %p907_p8, %p901_p5 }
  0x15   :  { %911 = shalt.err (!%p908_p9)
}
  0x16   :  { %24 = dma.hbm_to_vmem [thread:$0]  %s1100_s0, 512, %s19_s21, [#allocation4], %s960_s23, %s960_s23, %s961_s24  }
  0x17   :  { %s962_s30 = smov [#allocation8]  }
  0x18   :  { %s44_s6 = sshll.u32 %s962_s30, 4  ;;  %s45_s6 = int_to_ptr.vmem [resolvable:$true] %s44_s6 }
  0x19   :  { %s920_s7 = scalar_lea.vmem %s45_s6, 6144  ;;  %p925_p11 = scmp.lt.s32.totalorder %s45_s6, %s45_s6 }
  0x1a   :  { %p921_p10 = scmp.ne.s32.totalorder %s45_s6, %s920_s7  ;;  %p926_p12 = scmp.lt.s32.totalorder %s920_s7, %s920_s7 }
  0x1c   :  { %p927_p13 = por %p926_p12, %p925_p11 }
  0x1e   :  { %p928_p0 = pnand %p927_p13, %p921_p10 }
  0x20   :  { %931 = shalt.err (!%p928_p0)
}
  0x21   :  { %50 = dma.hbm_to_vmem [thread:$0]  %s1103_s3, 6144, %s45_s6, [#allocation7], %s960_s23, %s960_s23, %s961_s24  }
  0x22   :  { %952 = dma.done.wait [#allocation4], 512  }
  0x23   :  { %953 = vsyncadd [#allocation4], 4294966784 }
  0x24   :  { %954 = dma.done.wait [#allocation7], 12288  }
  0x25   :  { %955 = vsyncadd [#allocation7], 4294955008  ;;  %v963_v0 = vmov 0.0   ;;  %vm964_vm0 = vmmov 0   ;;  %v121_v1 = vld [vmem:[#allocation6 + $0xf8] sm:$0xff]  ;;  %v120_v3 = vld [vmem:[#allocation6 + $0xf0] sm:$0xff] }
  0x26   :  { %770 = vmatprep.subr.mxu1 %v963_v0  ;;  %62 = vst [vmem:[#allocation2] sm:$0x1] %v963_v0  ;;  %63 = vst [vmem:[#allocation2 + $0x11] sm:$0x1] %v963_v0  ;;  %802 = vmatprep.mubr.msk.f32.mxu1 %vm964_vm0, %v963_v0  ;;  %v105_v2 = vld [vmem:[#allocation6 + $0x78] sm:$0xff]  ;;  %v104_v4 = vld [vmem:[#allocation6 + $0x70] sm:$0xff] }
  0x27   :  { %64 = vst [vmem:[#allocation2 + $0x12] sm:$0x1] %v963_v0  ;;  %65 = vst [vmem:[#allocation2 + $0x23] sm:$0x1] %v963_v0  ;;  %634 = vmatprep.subr.mxu0 %v121_v1  ;;  %v119_v5 = vld [vmem:[#allocation6 + $0xe8] sm:$0xff]  ;;  %v137_v6 = vld [vmem:[#allocation6 + $0x178] sm:$0xff] }
  0x28   :  { %635 = vmatpush3.msra.mxu0 %v105_v2  ;;  %v103_v7 = vld [vmem:[#allocation6 + $0x68] sm:$0xff]  ;;  %771 = vmatpush3.msra.mxu1 %v137_v6  ;;  %v136_v8 = vld [vmem:[#allocation6 + $0x170] sm:$0xff]  ;;  %v118_v9 = vld [vmem:[#allocation6 + $0xe0] sm:$0xff]  ;;  %vm597_vm1 = vcmask 1041408  }
  0x29   :  { %636 = vmatprep.subr.mxu0 %v120_v3  ;;  %772 = vmatprep.subr.mxu1 %v963_v0  ;;  %v135_v10 = vld [vmem:[#allocation6 + $0x168] sm:$0xff]  ;;  %v102_v11 = vld [vmem:[#allocation6 + $0x60] sm:$0xff]  ;;  %v117_v12 = vld [vmem:[#allocation6 + $0xd8] sm:$0xff] }
  0x2a   :  { %637 = vmatpush3.msra.mxu0 %v104_v4  ;;  %773 = vmatpush3.msra.mxu1 %v136_v8  ;;  %v134_v13 = vld [vmem:[#allocation6 + $0x160] sm:$0xff]  ;;  %v101_v14 = vld [vmem:[#allocation6 + $0x58] sm:$0xff]  ;;  %v116_v15 = vld [vmem:[#allocation6 + $0xd0] sm:$0xff] }
  0x2b   :  { %638 = vmatprep.subr.mxu0 %v119_v5  ;;  %774 = vmatprep.subr.mxu1 %v963_v0  ;;  %v133_v16 = vld [vmem:[#allocation6 + $0x158] sm:$0xff]  ;;  %v100_v17 = vld [vmem:[#allocation6 + $0x50] sm:$0xff]  ;;  %v115_v18 = vld [vmem:[#allocation6 + $0xc8] sm:$0xff] }
  0x2c   :  { %639 = vmatpush3.msra.mxu0 %v103_v7  ;;  %775 = vmatpush3.msra.mxu1 %v135_v10  ;;  %v132_v19 = vld [vmem:[#allocation6 + $0x150] sm:$0xff]  ;;  %v99_v20 = vld [vmem:[#allocation6 + $0x48] sm:$0xff]  ;;  %v114_v21 = vld [vmem:[#allocation6 + $0xc0] sm:$0xff] }
  0x2d   :  { %640 = vmatprep.subr.mxu0 %v118_v9  ;;  %776 = vmatprep.subr.mxu1 %v963_v0  ;;  %v131_v22 = vld [vmem:[#allocation6 + $0x148] sm:$0xff]  ;;  %v98_v23 = vld [vmem:[#allocation6 + $0x40] sm:$0xff]  ;;  %v113_v24 = vld [vmem:[#allocation6 + $0xb8] sm:$0xff] }
  0x2e   :  { %641 = vmatpush3.msra.mxu0 %v102_v11  ;;  %777 = vmatpush3.msra.mxu1 %v134_v13  ;;  %v130_v25 = vld [vmem:[#allocation6 + $0x140] sm:$0xff]  ;;  %v97_v26 = vld [vmem:[#allocation6 + $0x38] sm:$0xff]  ;;  %v112_v27 = vld [vmem:[#allocation6 + $0xb0] sm:$0xff] }
  0x2f   :  { %642 = vmatprep.subr.mxu0 %v117_v12  ;;  %778 = vmatprep.subr.mxu1 %v963_v0  ;;  %v1027_v28 = vld [vmem:[#allocation3] sm:$0xff]  ;;  %v129_v29 = vld [vmem:[#allocation6 + $0x138] sm:$0xff]  ;;  %v1031_v30 = vld [vmem:[#allocation3 + $0x8] sm:$0xff] }
  0x30   :  { %643 = vmatpush3.msra.mxu0 %v101_v14  ;;  %779 = vmatpush3.msra.mxu1 %v133_v16  ;;  %68 = vst [vmem:[#allocation2 + $0x1] sm:$0xff] %v1027_v28  ;;  %v1033_v31 = vld [vmem:[#allocation3 + $0x10] sm:$0xff]  ;;  %69 = vst [vmem:[#allocation2 + $0x9] sm:$0xff] %v1031_v30  ;;  %v1037_v33 = vld [vmem:[#allocation3 + $0x18] sm:$0xff] }
  0x31   :  { %644 = vmatprep.subr.mxu0 %v116_v15  ;;  %780 = vmatprep.subr.mxu1 %v963_v0  ;;  %v96_v32 = vld [vmem:[#allocation6 + $0x30] sm:$0xff]  ;;  %73 = vst [vmem:[#allocation2 + $0x13] sm:$0xff] %v1033_v31  ;;  %v111_v34 = vld [vmem:[#allocation6 + $0xa8] sm:$0xff]  ;;  %74 = vst [vmem:[#allocation2 + $0x1b] sm:$0xff] %v1037_v33 }
  0x32   :  { %645 = vmatpush3.msra.mxu0 %v100_v17  ;;  %781 = vmatpush3.msra.mxu1 %v132_v19  ;;  %v128_v35 = vld [vmem:[#allocation6 + $0x130] sm:$0xff]  ;;  %v95_v36 = vld [vmem:[#allocation6 + $0x28] sm:$0xff]  ;;  %v110_v37 = vld [vmem:[#allocation6 + $0xa0] sm:$0xff] }
  0x33   :  { %646 = vmatprep.subr.mxu0 %v115_v18  ;;  %782 = vmatprep.subr.mxu1 %v963_v0  ;;  %v127_v38 = vld [vmem:[#allocation6 + $0x128] sm:$0xff]  ;;  %v94_v39 = vld [vmem:[#allocation6 + $0x20] sm:$0xff]  ;;  %v109_v40 = vld [vmem:[#allocation6 + $0x98] sm:$0xff] }
  0x34   :  { %647 = vmatpush3.msra.mxu0 %v99_v20  ;;  %783 = vmatpush3.msra.mxu1 %v131_v22  ;;  %v126_v41 = vld [vmem:[#allocation6 + $0x120] sm:$0xff]  ;;  %v93_v42 = vld [vmem:[#allocation6 + $0x18] sm:$0xff]  ;;  %v108_v43 = vld [vmem:[#allocation6 + $0x90] sm:$0xff] }
  0x35   :  { %648 = vmatprep.subr.mxu0 %v114_v21  ;;  %784 = vmatprep.subr.mxu1 %v963_v0  ;;  %v125_v44 = vld [vmem:[#allocation6 + $0x118] sm:$0xff]  ;;  %v92_v45 = vld [vmem:[#allocation6 + $0x10] sm:$0xff]  ;;  %v107_v46 = vld [vmem:[#allocation6 + $0x88] sm:$0xff] }
  0x36   :  { %649 = vmatpush3.msra.mxu0 %v98_v23  ;;  %785 = vmatpush3.msra.mxu1 %v130_v25  ;;  %v91_v47 = vld [vmem:[#allocation6 + $0x8] sm:$0xff]  ;;  %v124_v48 = vld [vmem:[#allocation6 + $0x110] sm:$0xff]  ;;  %v106_v49 = vld [vmem:[#allocation6 + $0x80] sm:$0xff] }
  0x37   :  { %650 = vmatprep.subr.mxu0 %v113_v24  ;;  %786 = vmatprep.subr.mxu1 %v963_v0  ;;  %v90_v50 = vld [vmem:[#allocation6] sm:$0xff]  ;;  %v123_v51 = vld [vmem:[#allocation6 + $0x108] sm:$0xff]  ;;  %v75_v52 = vld [vmem:[#allocation2] sm:$0xff] }
  0x38   :  { %651 = vmatpush3.msra.mxu0 %v97_v26  ;;  %787 = vmatpush3.msra.mxu1 %v129_v29  ;;  %v122_v53 = vld [vmem:[#allocation6 + $0x100] sm:$0xff]  ;;  %v381_v55 = vld [vmem:[#allocation8 + $0xf8] sm:$0xff]  ;;  %v380_v58 = vld [vmem:[#allocation8 + $0xf0] sm:$0xff] }
  0x39   :  { %652 = vmatprep.subr.mxu0 %v112_v27  ;;  %788 = vmatprep.subr.mxu1 %v963_v0  ;;  %v85_v54 = vld [vmem:[#allocation2 + $0x2] sm:$0xff]  ;;  %v82_v59 = vld [vmem:[#allocation2 + $0x11] sm:$0xff]  ;;  %v83_v2 = vld [vmem:[#allocation2 + $0x19] sm:$0xff] }
  0x3a   :  { %653 = vmatpush3.msra.mxu0 %v96_v32  ;;  %789 = vmatpush3.msra.mxu1 %v128_v35  ;;  %v365_v56 = vld [vmem:[#allocation8 + $0x78] sm:$0xff]  ;;  %v76_v57 = vld [vmem:[#allocation2 + $0x8] sm:$0xff]  ;;  %v364_v60 = vld [vmem:[#allocation8 + $0x70] sm:$0xff] }
  0x3b   :  { %654 = vmatprep.subr.mxu0 %v111_v34  ;;  %790 = vmatprep.subr.mxu1 %v963_v0  ;;  %v86_v61 = vld [vmem:[#allocation2 + $0xa] sm:$0xff]  ;;  %v397_v1 = vld [vmem:[#allocation8 + $0x178] sm:$0xff]  ;;  %v87_v4 = vld [vmem:[#allocation2 + $0x12] sm:$0xff] }
  0x3c   :  { %655 = vmatpush3.msra.mxu0 %v95_v36  ;;  %791 = vmatpush3.msra.mxu1 %v127_v38  ;;  %v379_v62 = vld [vmem:[#allocation8 + $0xe8] sm:$0xff]  ;;  %v378_v5 = vld [vmem:[#allocation8 + $0xe0] sm:$0xff]  ;;  %v78_v6 = vld [vmem:[#allocation2 + $0x18] sm:$0xff] }
  0x3d   :  { %656 = vmatprep.subr.mxu0 %v110_v37  ;;  %792 = vmatprep.subr.mxu1 %v963_v0  ;;  %v77_v63 = vld [vmem:[#allocation2 + $0x10] sm:$0xff]  ;;  %v396_v7 = vld [vmem:[#allocation8 + $0x170] sm:$0xff]  ;;  %v84_v8 = vld [vmem:[#allocation2 + $0x21] sm:$0x3] }
  0x3e   :  { %657 = vmatpush3.msra.mxu0 %v94_v39  ;;  %793 = vmatpush3.msra.mxu1 %v126_v41  ;;  %v363_v3 = vld [vmem:[#allocation8 + $0x68] sm:$0xff]  ;;  %v362_v9 = vld [vmem:[#allocation8 + $0x60] sm:$0xff]  ;;  %v88_v10 = vld [vmem:[#allocation2 + $0x1a] sm:$0xff] }
  0x3f   :  { %658 = vmatprep.subr.mxu0 %v109_v40  ;;  %794 = vmatprep.subr.mxu1 %v963_v0  ;;  %v377_v11 = vld [vmem:[#allocation8 + $0xd8] sm:$0xff]  ;;  %v395_v13 = vld [vmem:[#allocation8 + $0x168] sm:$0xff]  ;;  %v376_v16 = vld [vmem:[#allocation8 + $0xd0] sm:$0xff] }
  0x40   :  { %659 = vmatpush3.msra.mxu0 %v93_v42  ;;  %795 = vmatpush3.msra.mxu1 %v125_v44  ;;  %v79_v12 = vld [vmem:[#allocation2 + $0x20] sm:$0x3]  ;;  %v89_v15 = vld [vmem:[#allocation2 + $0x22] sm:$0x3]  ;;  %v394_v17 = vld [vmem:[#allocation8 + $0x160] sm:$0xff] }
  0x41   :  { %660 = vmatprep.subr.mxu0 %v108_v43  ;;  %796 = vmatprep.subr.mxu1 %v963_v0  ;;  %v361_v14 = vld [vmem:[#allocation8 + $0x58] sm:$0xff]  ;;  %v360_v18 = vld [vmem:[#allocation8 + $0x50] sm:$0xff]  ;;  %v375_v19 = vld [vmem:[#allocation8 + $0xc8] sm:$0xff] }
  0x42   :  { %661 = vmatpush3.msra.mxu0 %v92_v45  ;;  %209 = vmatprep.mubr.f32.mxu0 %v1027_v28  ;;  %v393_v20 = vld [vmem:[#allocation8 + $0x158] sm:$0xff]  ;;  %v359_v21 = vld [vmem:[#allocation8 + $0x48] sm:$0xff]  ;;  %v374_v22 = vld [vmem:[#allocation8 + $0xc0] sm:$0xff] }
  0x43   :  { %662 = vmatprep.subr.mxu0 %v107_v46  ;;  %797 = vmatpush3.msra.mxu1 %v124_v48  ;;  %v392_v23 = vld [vmem:[#allocation8 + $0x150] sm:$0xff]  ;;  %v358_v24 = vld [vmem:[#allocation8 + $0x40] sm:$0xff]  ;;  %v373_v25 = vld [vmem:[#allocation8 + $0xb8] sm:$0xff] }
  0x44   :  { %663 = vmatpush3.msra.mxu0 %v91_v47  ;;  %798 = vmatprep.subr.mxu1 %v963_v0  ;;  %v391_v26 = vld [vmem:[#allocation8 + $0x148] sm:$0xff]  ;;  %v357_v27 = vld [vmem:[#allocation8 + $0x38] sm:$0xff]  ;;  %v372_v29 = vld [vmem:[#allocation8 + $0xb0] sm:$0xff] }
  0x45   :  { %664 = vmatprep.subr.mxu0 %v106_v49  ;;  %799 = vmatpush3.msra.mxu1 %v123_v51  ;;  %v390_v32 = vld [vmem:[#allocation8 + $0x140] sm:$0xff]  ;;  %v356_v34 = vld [vmem:[#allocation8 + $0x30] sm:$0xff]  ;;  %v371_v35 = vld [vmem:[#allocation8 + $0xa8] sm:$0xff] }
  0x46   :  { %665 = vmatpush3.msra.mxu0 %v90_v50  ;;  %800 = vmatprep.subr.mxu1 %v963_v0  ;;  %v389_v36 = vld [vmem:[#allocation8 + $0x138] sm:$0xff]  ;;  %v355_v37 = vld [vmem:[#allocation8 + $0x28] sm:$0xff]  ;;  %v370_v38 = vld [vmem:[#allocation8 + $0xa0] sm:$0xff] }
  0x47   :  { %210 = vmatmul.mubr.f32.vlgmr.msra.gmra.mxu0 %v75_v52  ;;  %801 = vmatpush3.msra.mxu1 %v122_v53  ;;  %v388_v39 = vld [vmem:[#allocation8 + $0x130] sm:$0xff]  ;;  %v354_v40 = vld [vmem:[#allocation8 + $0x20] sm:$0xff]  ;;  %v369_v41 = vld [vmem:[#allocation8 + $0x98] sm:$0xff] }
  0x48   :  { %214 = vmatprep.mubr.f32.mxu0 %v1031_v30  ;;  %803 = vmatmul.mubr.f32.vlgmr.msra.gmra.mxu1 %v85_v54  ;;  %v387_v42 = vld [vmem:[#allocation8 + $0x128] sm:$0xff]  ;;  %v353_v43 = vld [vmem:[#allocation8 + $0x18] sm:$0xff]  ;;  %v368_v44 = vld [vmem:[#allocation8 + $0x90] sm:$0xff] }
  0x49   :  { %702 = vmatprep.subr.mxu0 %v381_v55  ;;  %805 = vmatprep.mubr.msk.f32.mxu1 %vm964_vm0, %v963_v0  ;;  %v386_v45 = vld [vmem:[#allocation8 + $0x120] sm:$0xff]  ;;  %v352_v46 = vld [vmem:[#allocation8 + $0x10] sm:$0xff]  ;;  %v367_v47 = vld [vmem:[#allocation8 + $0x88] sm:$0xff] }
  0x4a   :  { %703 = vmatpush3.msra.mxu0 %v365_v56  ;;  %817 = vmatprep.subr.mxu1 %v963_v0  ;;  %v385_v48 = vld [vmem:[#allocation8 + $0x118] sm:$0xff]  ;;  %v351_v49 = vld [vmem:[#allocation8 + $0x8] sm:$0xff]  ;;  %v366_v50 = vld [vmem:[#allocation8 + $0x80] sm:$0xff] }
  0x4b   :  { %215 = vmatmul.mubr.f32.gmra.mxu0 %v76_v57  ;;  %704 = vmatprep.subr.mxu0 %v380_v58  ;;  %v384_v51 = vld [vmem:[#allocation8 + $0x110] sm:$0xff]  ;;  %v350_v52 = vld [vmem:[#allocation8] sm:$0xff]  ;;  %v383_v53 = vld [vmem:[#allocation8 + $0x108] sm:$0xff] }
  0x4c   :  { %219 = vmatprep.mubr.f32.mxu0 %v82_v59  ;;  %705 = vmatpush3.msra.mxu0 %v364_v60  ;;  %v382_v54 = vld [vmem:[#allocation8 + $0x100] sm:$0xff]  ;;  %v632_v57 = vld [vmem:[%s1102_s2] ss:$0 sm:$0xff] }
  0x4d   :  { %806 = vmatmul.mubr.f32.gmra.mxu1 %v86_v61  ;;  %706 = vmatprep.subr.mxu0 %v379_v62 }
  0x4e   :  { %808 = vmatprep.mubr.msk.f32.mxu1 %vm964_vm0, %v963_v0  ;;  %818 = vmatpush3.msra.mxu1 %v397_v1 }
  0x4f   :  { %220 = vmatmul.mubr.f32.gmra.mxu0 %v77_v63  ;;  %819 = vmatprep.subr.mxu1 %v963_v0 }
  0x50   :  { %224 = vmatprep.mubr.f32.mxu0 %v83_v2  ;;  %707 = vmatpush3.msra.mxu0 %v363_v3 }
  0x51   :  { %809 = vmatmul.mubr.f32.gmra.mxu1 %v87_v4  ;;  %708 = vmatprep.subr.mxu0 %v378_v5 }
  0x52   :  { %811 = vmatprep.mubr.msk.f32.mxu1 %vm964_vm0, %v963_v0  ;;  %820 = vmatpush3.msra.mxu1 %v396_v7 }
  0x53   :  { %225 = vmatmul.mubr.f32.gmra.mxu0 %v78_v6  ;;  %821 = vmatprep.subr.mxu1 %v963_v0 }
  0x54   :  { %229 = vmatprep.mubr.f32.mxu0 %v84_v8  ;;  %709 = vmatpush3.msra.mxu0 %v362_v9 }
  0x55   :  { %812 = vmatmul.mubr.f32.gmra.mxu1 %v88_v10  ;;  %710 = vmatprep.subr.mxu0 %v377_v11 }
  0x56   :  { %814 = vmatprep.mubr.msk.f32.mxu1 %vm964_vm0, %v963_v0  ;;  %822 = vmatpush3.msra.mxu1 %v395_v13 }
  0x57   :  { %230 = vmatmul.mubr.f32.gmra.mxu0 %v79_v12  ;;  %823 = vmatprep.subr.mxu1 %v963_v0 }
  0x58   :  { %711 = vmatpush3.msra.mxu0 %v361_v14  ;;  %824 = vmatpush3.msra.mxu1 %v394_v17 }
  0x59   :  { %815 = vmatmul.mubr.f32.gmra.mxu1 %v89_v15  ;;  %712 = vmatprep.subr.mxu0 %v376_v16 }
  0x5a   :  { %713 = vmatpush3.msra.mxu0 %v360_v18  ;;  %825 = vmatprep.subr.mxu1 %v963_v0 }
  0x5b   :  { %849 = vmatprep.mubr.msk.f32.mxu1 %vm964_vm0, %v963_v0  ;;  %714 = vmatprep.subr.mxu0 %v375_v19 }
  0x5c   :  { %826 = vmatpush3.msra.mxu1 %v393_v20  ;;  %715 = vmatpush3.msra.mxu0 %v359_v21 }
  0x5d   :  { %827 = vmatprep.subr.mxu1 %v963_v0  ;;  %716 = vmatprep.subr.mxu0 %v374_v22 }
  0x5e   :  { %828 = vmatpush3.msra.mxu1 %v392_v23  ;;  %717 = vmatpush3.msra.mxu0 %v358_v24 }
  0x5f   :  { %829 = vmatprep.subr.mxu1 %v963_v0  ;;  %718 = vmatprep.subr.mxu0 %v373_v25 }
  0x60   :  { %830 = vmatpush3.msra.mxu1 %v391_v26  ;;  %719 = vmatpush3.msra.mxu0 %v357_v27 }
  0x61   :  { %831 = vmatprep.subr.mxu1 %v963_v0  ;;  %720 = vmatprep.subr.mxu0 %v372_v29 }
  0x62   :  { %832 = vmatpush3.msra.mxu1 %v390_v32  ;;  %721 = vmatpush3.msra.mxu0 %v356_v34 }
  0x63   :  { %833 = vmatprep.subr.mxu1 %v963_v0  ;;  %722 = vmatprep.subr.mxu0 %v371_v35 }
  0x64   :  { %834 = vmatpush3.msra.mxu1 %v389_v36  ;;  %723 = vmatpush3.msra.mxu0 %v355_v37 }
  0x65   :  { %835 = vmatprep.subr.mxu1 %v963_v0  ;;  %724 = vmatprep.subr.mxu0 %v370_v38 }
  0x66   :  { %836 = vmatpush3.msra.mxu1 %v388_v39  ;;  %725 = vmatpush3.msra.mxu0 %v354_v40 }
  0x67   :  { %837 = vmatprep.subr.mxu1 %v963_v0  ;;  %726 = vmatprep.subr.mxu0 %v369_v41 }
  0x68   :  { %838 = vmatpush3.msra.mxu1 %v387_v42  ;;  %727 = vmatpush3.msra.mxu0 %v353_v43 }
  0x69   :  { %839 = vmatprep.subr.mxu1 %v963_v0  ;;  %728 = vmatprep.subr.mxu0 %v368_v44 }
  0x6a   :  { %840 = vmatpush3.msra.mxu1 %v386_v45  ;;  %729 = vmatpush3.msra.mxu0 %v352_v46 }
  0x6b   :  { %841 = vmatprep.subr.mxu1 %v963_v0  ;;  %730 = vmatprep.subr.mxu0 %v367_v47 }
  0x6c   :  { %842 = vmatpush3.msra.mxu1 %v385_v48  ;;  %731 = vmatpush3.msra.mxu0 %v351_v49 }
  0x6d   :  { %843 = vmatprep.subr.mxu1 %v963_v0  ;;  %732 = vmatprep.subr.mxu0 %v366_v50 }
  0x6e   :  { %844 = vmatpush3.msra.mxu1 %v384_v51  ;;  %733 = vmatpush3.msra.mxu0 %v350_v52  ;;  %v633_v51 = vld [vmem:[%s1104_s4] ss:$0 sm:$0xff]  ;;  %s965_s4 = smov [#allocation9]  }
  0x6f   :  { %845 = vmatprep.subr.mxu1 %v963_v0  ;;  %s619_s10 = sshll.u32 %s965_s4, 4  ;;  %s620_s10 = int_to_ptr.vmem [resolvable:$true] %s619_s10 }
  0x70   :  { %846 = vmatpush3.msra.mxu1 %v383_v53  ;;  %s932_s11 = scalar_lea.vmem %s620_s10, 512  ;;  %p937_p2 = scmp.lt.s32.totalorder %s620_s10, %s620_s10 }
  0x71   :  { %847 = vmatprep.subr.mxu1 %v963_v0  ;;  %p933_p1 = scmp.ne.s32.totalorder %s620_s10, %s932_s11  ;;  %p938_p3 = scmp.lt.s32.totalorder %s932_s11, %s932_s11 }
  0x72   :  { %848 = vmatpush3.msra.mxu1 %v382_v54 }
  0x73   :  { %p939_p4 = por %p938_p3, %p937_p2 }
  0x75   :  { %p940_p5 = pnand %p939_p4, %p933_p1 }
 0x107   :  { %v666_v55 = vpop.f32.mrf.mxu0 }
 0x108   :  { %v301_v58 = vpop.f32.mrf.mxu1 }
 0x109   :  { %v667_v56 = vpop.f32.mrf.mxu0 }
 0x10a   :  { %v668_v59 = vadd.f32 %v667_v56, %v666_v55  ;;  %v804_v61 = vpop.f32.mrf.mxu1 }
 0x10b   :  { %v669_v60 = vpop.f32.mrf.mxu0 }
 0x10c   :  { %v212_v62 = vadd.f32 %v668_v59, %v632_v57 }
 0x10d   :  { %v670_v63 = vpop.f32.mrf.mxu0  ;;  %v306_v1 = vpop.f32.mrf.mxu1 }
 0x10e   :  { %v302_v2 = vadd.f32 %v301_v58, %v212_v62  ;;  %v671_v3 = vadd.f32 %v670_v63, %v669_v60 }
 0x10f   :  { %v672_v4 = vpop.f32.mrf.mxu0  ;;  %v807_v5 = vpop.f32.mrf.mxu1 }
 0x110   :  { %v325_v6 = vmax.f32 %v302_v2, 0.0  ;;  %v217_v7 = vadd.f32 %v671_v3, %v632_v57 }
 0x111   :  { %v673_v8 = vpop.f32.mrf.mxu0  ;;  %v311_v9 = vpop.f32.mrf.mxu1 }
 0x112   :  { %330 = vst [vmem:[#allocation2 + $0x1] sm:$0xff] %v325_v6  ;;  %v307_v10 = vadd.f32 %v306_v1, %v217_v7  ;;  %v674_v11 = vadd.f32 %v673_v8, %v672_v4  ;;  %469 = vmatprep.mubr.f32.mxu0 %v325_v6 }
 0x113   :  { %v675_v12 = vpop.f32.mrf.mxu0  ;;  %v810_v13 = vpop.f32.mrf.mxu1 }
 0x114   :  { %v326_v14 = vmax.f32 %v307_v10, 0.0  ;;  %v222_v15 = vadd.f32 %v674_v11, %v632_v57 }
 0x115   :  { %v676_v16 = vpop.f32.mrf.mxu0  ;;  %v316_v17 = vpop.f32.mrf.mxu1 }
 0x116   :  { %331 = vst [vmem:[#allocation2 + $0x9] sm:$0xff] %v326_v14  ;;  %v312_v18 = vadd.f32 %v311_v9, %v222_v15  ;;  %v677_v19 = vadd.f32 %v676_v16, %v675_v12  ;;  %v598_v9 = vrot.slane %v1033_v31, 6 }
 0x117   :  { %v678_v20 = vpop.f32.mrf.mxu0  ;;  %v813_v21 = vpop.f32.mrf.mxu1 }
 0x118   :  { %v327_v22 = vmax.f32 %v312_v18, 0.0  ;;  %v227_v23 = vadd.f32 %v677_v19, %v632_v57 }
 0x119   :  { %v679_v24 = vpop.f32.mrf.mxu0  ;;  %v321_v25 = vpop.f32.mrf.mxu1  ;;  %v335_v26 = vld [vmem:[#allocation2] sm:$0xff] }
 0x11a   :  { %332 = vst [vmem:[#allocation2 + $0x11] sm:$0xfc] %v327_v22  ;;  %v317_v27 = vadd.f32 %v316_v17, %v227_v23  ;;  %v680_v29 = vadd.f32 %v679_v24, %v678_v20  ;;  %470 = vmatmul.mubr.f32.vlgmr.msra.gmra.mxu0 %v335_v26 }
 0x11b   :  { %v816_v32 = vpop.f32.mrf.mxu1  ;;  %474 = vmatprep.mubr.f32.mxu0 %v326_v14 }
 0x11c   :  { %v328_v34 = vmax.f32 %v317_v27, 0.0  ;;  %v232_v35 = vadd.f32 %v680_v29, %v632_v57 }
 0x11d   :  { %v345_v36 = vld [vmem:[#allocation2 + $0x2] sm:$0xff]  ;;  %v346_v41 = vld [vmem:[#allocation2 + $0xa] sm:$0xff] }
 0x11e   :  { %v336_v37 = vld [vmem:[#allocation2 + $0x8] sm:$0xff]  ;;  %333 = vst [vmem:[#allocation2 + $0x19] sm:$0xff] %v328_v34  ;;  %v322_v38 = vadd.f32 %v321_v25, %v232_v35  ;;  %850 = vmatmul.mubr.f32.vlgmr.msra.gmra.mxu1 %v345_v36 }
 0x11f   :  { %475 = vmatmul.mubr.f32.gmra.mxu0 %v336_v37  ;;  %852 = vmatprep.mubr.msk.f32.mxu1 %vm964_vm0, %v963_v0 }
 0x120   :  { %v329_v39 = vmax.f32 %v322_v38, 0.0 }
 0x121   :  { %v342_v40 = vld [vmem:[#allocation2 + $0x11] sm:$0xff] }
 0x122   :  { %v337_v42 = vld [vmem:[#allocation2 + $0x10] sm:$0xff]  ;;  %334 = vst [vmem:[#allocation2 + $0x21] sm:$0x3] %v329_v39  ;;  %479 = vmatprep.mubr.f32.mxu0 %v342_v40  ;;  %853 = vmatmul.mubr.f32.gmra.mxu1 %v346_v41 }
 0x123   :  { %480 = vmatmul.mubr.f32.gmra.mxu0 %v337_v42  ;;  %855 = vmatprep.mubr.msk.f32.mxu1 %vm964_vm0, %v963_v0 }
 0x124   :  { %484 = vmatprep.mubr.f32.mxu0 %v328_v34 }
 0x125   :  { %v347_v43 = vld [vmem:[#allocation2 + $0x12] sm:$0xff] }
 0x126   :  { %v338_v44 = vld [vmem:[#allocation2 + $0x18] sm:$0xff]  ;;  %856 = vmatmul.mubr.f32.gmra.mxu1 %v347_v43 }
 0x127   :  { %485 = vmatmul.mubr.f32.gmra.mxu0 %v338_v44  ;;  %858 = vmatprep.mubr.msk.f32.mxu1 %vm964_vm0, %v963_v0 }
 0x129   :  { %v344_v45 = vld [vmem:[#allocation2 + $0x21] sm:$0x3] }
 0x12a   :  { %v348_v46 = vld [vmem:[#allocation2 + $0x1a] sm:$0xff]  ;;  %489 = vmatprep.mubr.f32.mxu0 %v344_v45  ;;  %v349_v48 = vld [vmem:[#allocation2 + $0x22] sm:$0x3] }
 0x12b   :  { %v339_v47 = vld [vmem:[#allocation2 + $0x20] sm:$0x3]  ;;  %859 = vmatmul.mubr.f32.gmra.mxu1 %v348_v46 }
 0x12c   :  { %490 = vmatmul.mubr.f32.gmra.mxu0 %v339_v47  ;;  %861 = vmatprep.mubr.msk.f32.mxu1 %vm964_vm0, %v963_v0 }
 0x12f   :  { %862 = vmatmul.mubr.f32.gmra.mxu1 %v349_v48 }
 0x1da   :  { %v734_v49 = vpop.f32.mrf.mxu0 }
 0x1dc   :  { %v735_v50 = vpop.f32.mrf.mxu0 }
 0x1dd   :  { %v736_v52 = vadd.f32 %v735_v50, %v734_v49 }
 0x1de   :  { %v561_v53 = vpop.f32.mrf.mxu1 }
 0x1df   :  { %v737_v54 = vpop.f32.mrf.mxu0  ;;  %v472_v55 = vadd.f32 %v736_v52, %v633_v51 }
 0x1e0   :  { %v851_v56 = vpop.f32.mrf.mxu1 }
 0x1e1   :  { %v738_v57 = vpop.f32.mrf.mxu0  ;;  %v562_v58 = vadd.f32 %v561_v53, %v472_v55 }
 0x1e2   :  { %v739_v59 = vadd.f32 %v738_v57, %v737_v54  ;;  %v566_v60 = vpop.f32.mrf.mxu1 }
 0x1e3   :  { %v587_v61 = vadd.f32 %v562_v58, %v1027_v28  ;;  %v740_v62 = vpop.f32.mrf.mxu0  ;;  %v599_v28 = vrot.slane %v1037_v33, 6 }
 0x1e4   :  { %v477_v0 = vadd.f32 %v739_v59, %v633_v51  ;;  %v854_v63 = vpop.f32.mrf.mxu1 }
 0x1e5   :  { %v589_v1 = vmax.f32 %v587_v61, 0.0  ;;  %v741_v3 = vpop.f32.mrf.mxu0  ;;  %v600_v20 = vsel %vm597_vm1, %v598_v9, %v599_v28 }
 0x1e6   :  { %v567_v2 = vadd.f32 %v566_v60, %v477_v0  ;;  %v742_v4 = vadd.f32 %v741_v3, %v740_v62  ;;  %v571_v5 = vpop.f32.mrf.mxu1 }
 0x1e7   :  { %591 = vst [vmem:[#allocation9] sm:$0xff] %v589_v1  ;;  %v743_v7 = vpop.f32.mrf.mxu0 }
 0x1e8   :  { %v588_v6 = vadd.f32 %v567_v2, %v1031_v30  ;;  %v482_v8 = vadd.f32 %v742_v4, %v633_v51  ;;  %v857_v10 = vpop.f32.mrf.mxu1 }
 0x1e9   :  { %v744_v12 = vpop.f32.mrf.mxu0 }
 0x1ea   :  { %v590_v11 = vmax.f32 %v588_v6, 0.0  ;;  %v572_v13 = vadd.f32 %v571_v5, %v482_v8  ;;  %v745_v14 = vadd.f32 %v744_v12, %v743_v7 }
 0x1eb   :  { %v576_v15 = vpop.f32.mrf.mxu1 }
 0x1ec   :  { %592 = vst [vmem:[#allocation9 + $0x8] sm:$0xff] %v590_v11  ;;  %v746_v16 = vpop.f32.mrf.mxu0  ;;  %v604_v17 = vadd.f32 %v598_v9, %v572_v13  ;;  %v487_v18 = vadd.f32 %v745_v14, %v633_v51 }
 0x1ed   :  { %v860_v19 = vpop.f32.mrf.mxu1 }
 0x1ee   :  { %v747_v30 = vpop.f32.mrf.mxu0  ;;  %v607_v21 = vmax.f32 %v604_v17, 0.0  ;;  %v577_v22 = vadd.f32 %v576_v15, %v487_v18 }
 0x1ef   :  { %v748_v23 = vadd.f32 %v747_v30, %v746_v16  ;;  %v581_v31 = vpop.f32.mrf.mxu1 }
 0x1f0   :  { %611 = vst [vmem:[#allocation9 + $0xe] sm:$0xfc] %v607_v21  ;;  %v605_v24 = vadd.f32 %v600_v20, %v577_v22 }
 0x1f1   :  { %v492_v25 = vadd.f32 %v748_v23, %v633_v51  ;;  %v863_v26 = vpop.f32.mrf.mxu1 }
 0x1f2   :  { %v608_v33 = vmax.f32 %v605_v24, 0.0 }
 0x1f3   :  { %v582_v27 = vadd.f32 %v581_v31, %v492_v25 }
 0x1f4   :  { %612 = vst [vmem:[#allocation9 + $0x16] sm:$0xff] %v608_v33 }
 0x1f5   :  { %v606_v29 = vadd.f32 %v599_v28, %v582_v27 }
 0x1f7   :  { %v609_v32 = vmax.f32 %v606_v29, 0.0 }
 0x1f9   :  { %613 = vst [vmem:[#allocation9 + $0x1e] sm:$0x3] %v609_v32 }
 0x1fa   :  { %943 = shalt.err (!%p940_p5)
}
 0x1fb   :  { %625 = dma.vmem_to_hbm [thread:$0]  %s620_s10, 512, %s1105_s5, [#allocation5], %s960_s23, %s960_s23, %s961_s24  }
 0x1fc   :  { %956 = dma.done.wait [#allocation5], 512  }
 0x1fd   :  { %957 = vsyncadd [#allocation5], 4294966784 }
 0x1fe   :  { %629 = vsyncpa [#allocation4], 1 }
 0x1ff   :  { %630 = vsyncpa [#allocation7], 1 }
 0x200   :  { %631 = vsyncpa [#allocation5], 1 }

</bundles_post_ra>
